<compile_context>
chip_gen: v6e
topology: v6e:2x2x1
jax: 0.10.0
libtpu: 0.0.40
codegen_flags: <defaults>
</compile_context>

<pallas_src>
import functools

import jax
import jax.numpy as jnp
import numpy as np
from jax.experimental import pallas as pl
from jax.experimental.pallas import tpu as pltpu


# --------------------------- Pallas kernels ---------------------------------


def _conv_pool_act_bn_kernel(x_ref, w_ref, b_ref, scale_ref, shift_ref, o_ref,
                             *, KH, KW, PH, PW, slope):
    """Fused conv(KHxKW, stride 1) + 2x2 max-pool + LeakyReLU + BN, one image.

    x_ref: (1, 4, Hs, Ws, C) parity sub-grids of the zero-padded NHWC image:
           x_ref[0, 2*p + q, r, s, c] == x_padded[2*r + p, 2*s + q, c]
    w_ref: (KH*KW, C, OC) per-tap weight slabs
    b_ref / scale_ref / shift_ref: (1, OC)
    o_ref: (1, PH*PW, OC) pooled, activated, normalized output
    """
    _, C, OC = w_ref.shape
    npix = PH * PW

    acc = jnp.zeros((4 * npix, OC), jnp.float32)
    # Accumulate the KH*KW conv taps.  For each tap, the four 2x2-pool
    # positions (he, we) read an UNSTRIDED (PH, PW, C) window of one parity
    # sub-grid; the four windows are stacked along rows so one
    # (4*PH*PW, C) x (C, OC) matmul feeds all four pool taps at once.
    for kh in range(KH):
        for kw in range(KW):
            wins = []
            for he in range(2):
                for we in range(2):
                    a = he + kh           # padded-row offset = 2*ph + a
                    b = we + kw           # padded-col offset = 2*pw + b
                    win = x_ref[0, (a % 2) * 2 + (b % 2),
                                a // 2:a // 2 + PH,
                                b // 2:b // 2 + PW, :]        # (PH, PW, C)
                    wins.append(win.reshape(npix, C))
            lhs = jnp.concatenate(wins, axis=0)               # (4*npix, C)
            acc = acc + jnp.dot(lhs, w_ref[kh * KW + kw],
                                preferred_element_type=jnp.float32)

    # 2x2 max-pool == elementwise max over the four aligned row blocks.
    m = jnp.maximum(jnp.maximum(acc[0:npix], acc[npix:2 * npix]),
                    jnp.maximum(acc[2 * npix:3 * npix], acc[3 * npix:4 * npix]))
    z = m + b_ref[...]                                        # conv bias
    z = jnp.where(z > 0, z, slope * z)                        # LeakyReLU
    o_ref[0] = (z * scale_ref[...] + shift_ref[...]).astype(o_ref.dtype)


def _conv_act_bn_kernel(x_ref, w_ref, b_ref, scale_ref, shift_ref, o_ref,
                        *, KH, KW, OH, OW, slope):
    """Fused conv(KHxKW, stride 1) + LeakyReLU + BN (no pooling), one image.

    x_ref: (1, Hp, Wp, C) zero-padded NHWC image
    """
    _, C, OC = w_ref.shape
    npix = OH * OW

    acc = jnp.zeros((npix, OC), jnp.float32)
    for kh in range(KH):
        for kw in range(KW):
            win = x_ref[0, kh:kh + OH, kw:kw + OW, :]         # (OH, OW, C)
            acc = acc + jnp.dot(win.reshape(npix, C), w_ref[kh * KW + kw],
                                preferred_element_type=jnp.float32)

    z = acc + b_ref[...]
    z = jnp.where(z > 0, z, slope * z)                        # LeakyReLU
    o_ref[0] = (z * scale_ref[...] + shift_ref[...]).astype(o_ref.dtype)


# --------------------------- pallas_call wrappers ----------------------------


def _fused_pool_call(xsub, w_taps, bias2, scale2, shift2, *, KH, KW, PH, PW):
    N, _, Hs, Ws, C = xsub.shape
    KHW, _, OC = w_taps.shape
    kernel = functools.partial(_conv_pool_act_bn_kernel,
                               KH=KH, KW=KW, PH=PH, PW=PW, slope=0.01)
    return pl.pallas_call(
        kernel,
        out_shape=jax.ShapeDtypeStruct((N, PH * PW, OC), jnp.float32),
        grid_spec=pltpu.PrefetchScalarGridSpec(
            num_scalar_prefetch=0,
            grid=(N,),
            in_specs=[
                pl.BlockSpec((1, 4, Hs, Ws, C), lambda n: (n, 0, 0, 0, 0)),
                pl.BlockSpec((KHW, C, OC), lambda n: (0, 0, 0)),
                pl.BlockSpec((1, OC), lambda n: (0, 0)),
                pl.BlockSpec((1, OC), lambda n: (0, 0)),
                pl.BlockSpec((1, OC), lambda n: (0, 0)),
            ],
            out_specs=pl.BlockSpec((1, PH * PW, OC), lambda n: (n, 0, 0)),
        ),
        compiler_params=pltpu.CompilerParams(
            dimension_semantics=("parallel",)),
    )(xsub, w_taps, bias2, scale2, shift2)


def _fused_call(xp, w_taps, bias2, scale2, shift2, *, KH, KW, OH, OW):
    N, Hp, Wp, C = xp.shape
    KHW, _, OC = w_taps.shape
    kernel = functools.partial(_conv_act_bn_kernel,
                               KH=KH, KW=KW, OH=OH, OW=OW, slope=0.01)
    return pl.pallas_call(
        kernel,
        out_shape=jax.ShapeDtypeStruct((N, OH * OW, OC), jnp.float32),
        grid_spec=pltpu.PrefetchScalarGridSpec(
            num_scalar_prefetch=0,
            grid=(N,),
            in_specs=[
                pl.BlockSpec((1, Hp, Wp, C), lambda n: (n, 0, 0, 0)),
                pl.BlockSpec((KHW, C, OC), lambda n: (0, 0, 0)),
                pl.BlockSpec((1, OC), lambda n: (0, 0)),
                pl.BlockSpec((1, OC), lambda n: (0, 0)),
                pl.BlockSpec((1, OC), lambda n: (0, 0)),
            ],
            out_specs=pl.BlockSpec((1, OH * OW, OC), lambda n: (n, 0, 0)),
        ),
        compiler_params=pltpu.CompilerParams(
            dimension_semantics=("parallel",)),
    )(xp, w_taps, bias2, scale2, shift2)


# --------------------------- forward (glue in plain JAX) ---------------------


def basic_conv2d_forward(x_nchw, params, *, pool=True, padding=1):
    w, bias, gamma, beta, rmean, rvar = params
    OC, C, KH, KW = w.shape
    eps = 1e-3

    x = jnp.transpose(x_nchw, (0, 2, 3, 1)).astype(jnp.float32)  # NCHW -> NHWC
    N, H, W, _ = x.shape
    OH = H + 2 * padding - KH + 1
    OW = W + 2 * padding - KW + 1

    # Per-tap weight slabs: w_taps[kh*KW + kw, c, oc] = w[oc, c, kh, kw]
    w_taps = jnp.transpose(w, (2, 3, 1, 0)).reshape(KH * KW, C, OC)
    bias2 = bias.reshape(1, OC)
    # BatchNorm (inference) folded to per-channel scale/shift.
    inv = gamma / jnp.sqrt(rvar + eps)
    scale2 = inv.reshape(1, OC)
    shift2 = (beta - rmean * inv).reshape(1, OC)

    if pool:
        PH, PW = OH // 2, OW // 2                 # MaxPool2d(2) floors odd dims
        Hp, Wp = H + 2 * padding, W + 2 * padding
        Hp2, Wp2 = Hp + (Hp % 2), Wp + (Wp % 2)   # round padded extent to even
        xp = jnp.pad(x, ((0, 0),
                         (padding, padding + (Hp2 - Hp)),
                         (padding, padding + (Wp2 - Wp)),
                         (0, 0)))
        # Split into the 4 spatial parity sub-grids (~1x the input bytes):
        # xsub[n, 2p+q, r, s, c] = xp[n, 2r+p, 2s+q, c]
        Hs, Ws = Hp2 // 2, Wp2 // 2
        xsub = xp.reshape(N, Hs, 2, Ws, 2, C)
        xsub = jnp.transpose(xsub, (0, 2, 4, 1, 3, 5)).reshape(N, 4, Hs, Ws, C)
        out = _fused_pool_call(xsub, w_taps, bias2, scale2, shift2,
                               KH=KH, KW=KW, PH=PH, PW=PW)
        out = out.reshape(N, PH, PW, OC)
    else:
        xp = jnp.pad(x, ((0, 0), (padding, padding),
                         (padding, padding), (0, 0)))
        out = _fused_call(xp, w_taps, bias2, scale2, shift2,
                          KH=KH, KW=KW, OH=OH, OW=OW)
        out = out.reshape(N, OH, OW, OC)

    # TODO(synk): nn.Dropout(p=0.1) is stochastic only in train mode;
    #             inference (identity) semantics are implemented here.
    return jnp.transpose(out, (0, 3, 1, 2))       # NHWC -> NCHW


# --------------------------- pure-JAX reference ------------------------------


def _reference(x_nchw, params, *, pool=True, padding=1):
    w, bias, gamma, beta, rmean, rvar = params
    eps = 1e-3
    x = jnp.transpose(x_nchw, (0, 2, 3, 1)).astype(jnp.float32)
    conv = jax.lax.conv_general_dilated(
        x, jnp.transpose(w, (2, 3, 1, 0)),
        window_strides=(1, 1), padding=((padding, padding), (padding, padding)),
        dimension_numbers=("NHWC", "HWIO", "NHWC")) + bias.reshape(1, 1, 1, -1)
    if pool:
        N, OH, OW, OC = conv.shape
        conv = conv.reshape(N, OH // 2, 2, OW // 2, 2, OC).max(axis=(2, 4))
    y = jnp.where(conv > 0, conv, 0.01 * conv)
    y = (y - rmean) / jnp.sqrt(rvar + eps) * gamma + beta
    return jnp.transpose(y, (0, 3, 1, 2))


# --------------------------- main --------------------------------------------


if __name__ == "__main__":
    key = jax.random.PRNGKey(0)
    k1, k2, k3, k4, k5, k6, k7 = jax.random.split(key, 7)

    N, C, H, W = 2, 4, 16, 16
    OC, KH, KW = 8, 3, 3

    x = jax.random.normal(k1, (N, C, H, W), dtype=jnp.float32)
    weight = jax.random.normal(k2, (OC, C, KH, KW), dtype=jnp.float32) * 0.1
    bias = jax.random.normal(k3, (OC,), dtype=jnp.float32) * 0.1
    gamma = 1.0 + 0.1 * jax.random.normal(k4, (OC,), dtype=jnp.float32)
    beta = 0.1 * jax.random.normal(k5, (OC,), dtype=jnp.float32)
    rmean = 0.1 * jax.random.normal(k6, (OC,), dtype=jnp.float32)
    rvar = jnp.abs(1.0 + 0.1 * jax.random.normal(k7, (OC,), dtype=jnp.float32))

    params = (weight, bias, gamma, beta, rmean, rvar)

    # pool=True path (as used by BasicConv2d with pool=True)
    out = jax.block_until_ready(basic_conv2d_forward(x, params, pool=True))
    ref = jax.block_until_ready(_reference(x, params, pool=True))
    np.testing.assert_allclose(np.asarray(out), np.asarray(ref),
                               rtol=1e-4, atol=1e-4)
    assert out.shape == (N, OC, H // 2, W // 2)

    # pool=False path
    out_np = jax.block_until_ready(basic_conv2d_forward(x, params, pool=False))
    ref_np = jax.block_until_ready(_reference(x, params, pool=False))
    np.testing.assert_allclose(np.asarray(out_np), np.asarray(ref_np),
                               rtol=1e-4, atol=1e-4)
    assert out_np.shape == (N, OC, H, W)

    print("KERNEL_OK")
</pallas_src>

<mosaic_0001>
module attributes {stable_mosaic.version = 11 : i64} {
  func.func @_conv_pool_act_bn_kernel(%arg0: i32, %arg1: memref<1x4x9x9x4xf32, #tpu.memory_space<vmem>>, %arg2: memref<9x4x8xf32, #tpu.memory_space<vmem>>, %arg3: memref<1x8xf32, #tpu.memory_space<vmem>>, %arg4: memref<1x8xf32, #tpu.memory_space<vmem>>, %arg5: memref<1x8xf32, #tpu.memory_space<vmem>>, %arg6: memref<1x64x8xf32, #tpu.memory_space<vmem>>) attributes {dimension_semantics = [#tpu.dimension_semantics<parallel>], iteration_bounds = array<i64: 2>, scalar_prefetch = 0 : i64, scratch_operands = 0 : i64, tpu.core_type = #tpu.core_type<tc>, window_params = [{transform_indices = @transform_0, window_bounds = array<i64: 1, 4, 9, 9, 4>}, {pipeline_mode = #tpu.pipeline_mode<synchronous>, transform_indices = @transform_1, window_bounds = array<i64: 9, 4, 8>}, {pipeline_mode = #tpu.pipeline_mode<synchronous>, transform_indices = @transform_2, window_bounds = array<i64: 1, 8>}, {pipeline_mode = #tpu.pipeline_mode<synchronous>, transform_indices = @transform_3, window_bounds = array<i64: 1, 8>}, {pipeline_mode = #tpu.pipeline_mode<synchronous>, transform_indices = @transform_4, window_bounds = array<i64: 1, 8>}, {transform_indices = @transform_5, window_bounds = array<i64: 1, 64, 8>}]} {
    %cst = arith.constant 0.000000e+00 : f32
    %0 = vector.broadcast %cst : f32 to vector<256x8xf32>
    %c0 = arith.constant 0 : index
    %c0_0 = arith.constant 0 : index
    %c0_1 = arith.constant 0 : index
    %c0_2 = arith.constant 0 : index
    %c0_3 = arith.constant 0 : index
    %1 = vector.load %arg1[%c0, %c0_0, %c0_1, %c0_2, %c0_3] : memref<1x4x9x9x4xf32, #tpu.memory_space<vmem>>, vector<1x1x8x8x4xf32>
    %2 = vector.shape_cast %1 : vector<1x1x8x8x4xf32> to vector<8x8x4xf32>
    %3 = vector.shape_cast %2 : vector<8x8x4xf32> to vector<64x4xf32>
    %c0_4 = arith.constant 0 : index
    %c1 = arith.constant 1 : index
    %c0_5 = arith.constant 0 : index
    %c0_6 = arith.constant 0 : index
    %c0_7 = arith.constant 0 : index
    %4 = vector.load %arg1[%c0_4, %c1, %c0_5, %c0_6, %c0_7] : memref<1x4x9x9x4xf32, #tpu.memory_space<vmem>>, vector<1x1x8x8x4xf32>
    %5 = vector.shape_cast %4 : vector<1x1x8x8x4xf32> to vector<8x8x4xf32>
    %6 = vector.shape_cast %5 : vector<8x8x4xf32> to vector<64x4xf32>
    %c0_8 = arith.constant 0 : index
    %c2 = arith.constant 2 : index
    %c0_9 = arith.constant 0 : index
    %c0_10 = arith.constant 0 : index
    %c0_11 = arith.constant 0 : index
    %7 = vector.load %arg1[%c0_8, %c2, %c0_9, %c0_10, %c0_11] : memref<1x4x9x9x4xf32, #tpu.memory_space<vmem>>, vector<1x1x8x8x4xf32>
    %8 = vector.shape_cast %7 : vector<1x1x8x8x4xf32> to vector<8x8x4xf32>
    %9 = vector.shape_cast %8 : vector<8x8x4xf32> to vector<64x4xf32>
    %c0_12 = arith.constant 0 : index
    %c3 = arith.constant 3 : index
    %c0_13 = arith.constant 0 : index
    %c0_14 = arith.constant 0 : index
    %c0_15 = arith.constant 0 : index
    %10 = vector.load %arg1[%c0_12, %c3, %c0_13, %c0_14, %c0_15] : memref<1x4x9x9x4xf32, #tpu.memory_space<vmem>>, vector<1x1x8x8x4xf32>
    %11 = vector.shape_cast %10 : vector<1x1x8x8x4xf32> to vector<8x8x4xf32>
    %12 = vector.shape_cast %11 : vector<8x8x4xf32> to vector<64x4xf32>
    %13 = tpu.concatenate %3, %6, %9, %12 in 0 : vector<64x4xf32>, vector<64x4xf32>, vector<64x4xf32>, vector<64x4xf32> -> vector<256x4xf32>
    %c0_16 = arith.constant 0 : index
    %c0_17 = arith.constant 0 : index
    %c0_18 = arith.constant 0 : index
    %14 = vector.load %arg2[%c0_16, %c0_17, %c0_18] : memref<9x4x8xf32, #tpu.memory_space<vmem>>, vector<1x4x8xf32>
    %15 = vector.shape_cast %14 : vector<1x4x8xf32> to vector<4x8xf32>
    %cst_19 = arith.constant dense<0.000000e+00> : vector<256x8xf32>
    %16 = tpu.matmul %13, %15, %cst_19 {dimension_numbers = #tpu.dot_dimension_numbers<[1], [0], [0], [1], [0, 0, 1, 1], [], []>} : vector<256x4xf32>, vector<4x8xf32>, vector<256x8xf32> -> vector<256x8xf32>
    %17 = arith.addf %0, %16 : vector<256x8xf32>
    %c0_20 = arith.constant 0 : index
    %c1_21 = arith.constant 1 : index
    %c0_22 = arith.constant 0 : index
    %c0_23 = arith.constant 0 : index
    %c0_24 = arith.constant 0 : index
    %18 = vector.load %arg1[%c0_20, %c1_21, %c0_22, %c0_23, %c0_24] : memref<1x4x9x9x4xf32, #tpu.memory_space<vmem>>, vector<1x1x8x8x4xf32>
    %19 = vector.shape_cast %18 : vector<1x1x8x8x4xf32> to vector<8x8x4xf32>
    %20 = vector.shape_cast %19 : vector<8x8x4xf32> to vector<64x4xf32>
    %c0_25 = arith.constant 0 : index
    %c0_26 = arith.constant 0 : index
    %c0_27 = arith.constant 0 : index
    %c1_28 = arith.constant 1 : index
    %c0_29 = arith.constant 0 : index
    %21 = vector.load %arg1[%c0_25, %c0_26, %c0_27, %c1_28, %c0_29] : memref<1x4x9x9x4xf32, #tpu.memory_space<vmem>>, vector<1x1x8x8x4xf32>
    %22 = vector.shape_cast %21 : vector<1x1x8x8x4xf32> to vector<8x8x4xf32>
    %23 = vector.shape_cast %22 : vector<8x8x4xf32> to vector<64x4xf32>
    %c0_30 = arith.constant 0 : index
    %c3_31 = arith.constant 3 : index
    %c0_32 = arith.constant 0 : index
    %c0_33 = arith.constant 0 : index
    %c0_34 = arith.constant 0 : index
    %24 = vector.load %arg1[%c0_30, %c3_31, %c0_32, %c0_33, %c0_34] : memref<1x4x9x9x4xf32, #tpu.memory_space<vmem>>, vector<1x1x8x8x4xf32>
    %25 = vector.shape_cast %24 : vector<1x1x8x8x4xf32> to vector<8x8x4xf32>
    %26 = vector.shape_cast %25 : vector<8x8x4xf32> to vector<64x4xf32>
    %c0_35 = arith.constant 0 : index
    %c2_36 = arith.constant 2 : index
    %c0_37 = arith.constant 0 : index
    %c1_38 = arith.constant 1 : index
    %c0_39 = arith.constant 0 : index
    %27 = vector.load %arg1[%c0_35, %c2_36, %c0_37, %c1_38, %c0_39] : memref<1x4x9x9x4xf32, #tpu.memory_space<vmem>>, vector<1x1x8x8x4xf32>
    %28 = vector.shape_cast %27 : vector<1x1x8x8x4xf32> to vector<8x8x4xf32>
    %29 = vector.shape_cast %28 : vector<8x8x4xf32> to vector<64x4xf32>
    %30 = tpu.concatenate %20, %23, %26, %29 in 0 : vector<64x4xf32>, vector<64x4xf32>, vector<64x4xf32>, vector<64x4xf32> -> vector<256x4xf32>
    %c1_40 = arith.constant 1 : index
    %c0_41 = arith.constant 0 : index
    %c0_42 = arith.constant 0 : index
    %31 = vector.load %arg2[%c1_40, %c0_41, %c0_42] : memref<9x4x8xf32, #tpu.memory_space<vmem>>, vector<1x4x8xf32>
    %32 = vector.shape_cast %31 : vector<1x4x8xf32> to vector<4x8xf32>
    %cst_43 = arith.constant dense<0.000000e+00> : vector<256x8xf32>
    %33 = tpu.matmul %30, %32, %cst_43 {dimension_numbers = #tpu.dot_dimension_numbers<[1], [0], [0], [1], [0, 0, 1, 1], [], []>} : vector<256x4xf32>, vector<4x8xf32>, vector<256x8xf32> -> vector<256x8xf32>
    %34 = arith.addf %17, %33 : vector<256x8xf32>
    %c0_44 = arith.constant 0 : index
    %c0_45 = arith.constant 0 : index
    %c0_46 = arith.constant 0 : index
    %c1_47 = arith.constant 1 : index
    %c0_48 = arith.constant 0 : index
    %35 = vector.load %arg1[%c0_44, %c0_45, %c0_46, %c1_47, %c0_48] : memref<1x4x9x9x4xf32, #tpu.memory_space<vmem>>, vector<1x1x8x8x4xf32>
    %36 = vector.shape_cast %35 : vector<1x1x8x8x4xf32> to vector<8x8x4xf32>
    %37 = vector.shape_cast %36 : vector<8x8x4xf32> to vector<64x4xf32>
    %c0_49 = arith.constant 0 : index
    %c1_50 = arith.constant 1 : index
    %c0_51 = arith.constant 0 : index
    %c1_52 = arith.constant 1 : index
    %c0_53 = arith.constant 0 : index
    %38 = vector.load %arg1[%c0_49, %c1_50, %c0_51, %c1_52, %c0_53] : memref<1x4x9x9x4xf32, #tpu.memory_space<vmem>>, vector<1x1x8x8x4xf32>
    %39 = vector.shape_cast %38 : vector<1x1x8x8x4xf32> to vector<8x8x4xf32>
    %40 = vector.shape_cast %39 : vector<8x8x4xf32> to vector<64x4xf32>
    %c0_54 = arith.constant 0 : index
    %c2_55 = arith.constant 2 : index
    %c0_56 = arith.constant 0 : index
    %c1_57 = arith.constant 1 : index
    %c0_58 = arith.constant 0 : index
    %41 = vector.load %arg1[%c0_54, %c2_55, %c0_56, %c1_57, %c0_58] : memref<1x4x9x9x4xf32, #tpu.memory_space<vmem>>, vector<1x1x8x8x4xf32>
    %42 = vector.shape_cast %41 : vector<1x1x8x8x4xf32> to vector<8x8x4xf32>
    %43 = vector.shape_cast %42 : vector<8x8x4xf32> to vector<64x4xf32>
    %c0_59 = arith.constant 0 : index
    %c3_60 = arith.constant 3 : index
    %c0_61 = arith.constant 0 : index
    %c1_62 = arith.constant 1 : index
    %c0_63 = arith.constant 0 : index
    %44 = vector.load %arg1[%c0_59, %c3_60, %c0_61, %c1_62, %c0_63] : memref<1x4x9x9x4xf32, #tpu.memory_space<vmem>>, vector<1x1x8x8x4xf32>
    %45 = vector.shape_cast %44 : vector<1x1x8x8x4xf32> to vector<8x8x4xf32>
    %46 = vector.shape_cast %45 : vector<8x8x4xf32> to vector<64x4xf32>
    %47 = tpu.concatenate %37, %40, %43, %46 in 0 : vector<64x4xf32>, vector<64x4xf32>, vector<64x4xf32>, vector<64x4xf32> -> vector<256x4xf32>
    %c2_64 = arith.constant 2 : index
    %c0_65 = arith.constant 0 : index
    %c0_66 = arith.constant 0 : index
    %48 = vector.load %arg2[%c2_64, %c0_65, %c0_66] : memref<9x4x8xf32, #tpu.memory_space<vmem>>, vector<1x4x8xf32>
    %49 = vector.shape_cast %48 : vector<1x4x8xf32> to vector<4x8xf32>
    %cst_67 = arith.constant dense<0.000000e+00> : vector<256x8xf32>
    %50 = tpu.matmul %47, %49, %cst_67 {dimension_numbers = #tpu.dot_dimension_numbers<[1], [0], [0], [1], [0, 0, 1, 1], [], []>} : vector<256x4xf32>, vector<4x8xf32>, vector<256x8xf32> -> vector<256x8xf32>
    %51 = arith.addf %34, %50 : vector<256x8xf32>
    %c0_68 = arith.constant 0 : index
    %c2_69 = arith.constant 2 : index
    %c0_70 = arith.constant 0 : index
    %c0_71 = arith.constant 0 : index
    %c0_72 = arith.constant 0 : index
    %52 = vector.load %arg1[%c0_68, %c2_69, %c0_70, %c0_71, %c0_72] : memref<1x4x9x9x4xf32, #tpu.memory_space<vmem>>, vector<1x1x8x8x4xf32>
    %53 = vector.shape_cast %52 : vector<1x1x8x8x4xf32> to vector<8x8x4xf32>
    %54 = vector.shape_cast %53 : vector<8x8x4xf32> to vector<64x4xf32>
    %c0_73 = arith.constant 0 : index
    %c3_74 = arith.constant 3 : index
    %c0_75 = arith.constant 0 : index
    %c0_76 = arith.constant 0 : index
    %c0_77 = arith.constant 0 : index
    %55 = vector.load %arg1[%c0_73, %c3_74, %c0_75, %c0_76, %c0_77] : memref<1x4x9x9x4xf32, #tpu.memory_space<vmem>>, vector<1x1x8x8x4xf32>
    %56 = vector.shape_cast %55 : vector<1x1x8x8x4xf32> to vector<8x8x4xf32>
    %57 = vector.shape_cast %56 : vector<8x8x4xf32> to vector<64x4xf32>
    %c0_78 = arith.constant 0 : index
    %c0_79 = arith.constant 0 : index
    %c1_80 = arith.constant 1 : index
    %c0_81 = arith.constant 0 : index
    %c0_82 = arith.constant 0 : index
    %58 = vector.load %arg1[%c0_78, %c0_79, %c1_80, %c0_81, %c0_82] : memref<1x4x9x9x4xf32, #tpu.memory_space<vmem>>, vector<1x1x8x8x4xf32>
    %59 = vector.shape_cast %58 : vector<1x1x8x8x4xf32> to vector<8x8x4xf32>
    %60 = vector.shape_cast %59 : vector<8x8x4xf32> to vector<64x4xf32>
    %c0_83 = arith.constant 0 : index
    %c1_84 = arith.constant 1 : index
    %c1_85 = arith.constant 1 : index
    %c0_86 = arith.constant 0 : index
    %c0_87 = arith.constant 0 : index
    %61 = vector.load %arg1[%c0_83, %c1_84, %c1_85, %c0_86, %c0_87] : memref<1x4x9x9x4xf32, #tpu.memory_space<vmem>>, vector<1x1x8x8x4xf32>
    %62 = vector.shape_cast %61 : vector<1x1x8x8x4xf32> to vector<8x8x4xf32>
    %63 = vector.shape_cast %62 : vector<8x8x4xf32> to vector<64x4xf32>
    %64 = tpu.concatenate %54, %57, %60, %63 in 0 : vector<64x4xf32>, vector<64x4xf32>, vector<64x4xf32>, vector<64x4xf32> -> vector<256x4xf32>
    %c3_88 = arith.constant 3 : index
    %c0_89 = arith.constant 0 : index
    %c0_90 = arith.constant 0 : index
    %65 = vector.load %arg2[%c3_88, %c0_89, %c0_90] : memref<9x4x8xf32, #tpu.memory_space<vmem>>, vector<1x4x8xf32>
    %66 = vector.shape_cast %65 : vector<1x4x8xf32> to vector<4x8xf32>
    %cst_91 = arith.constant dense<0.000000e+00> : vector<256x8xf32>
    %67 = tpu.matmul %64, %66, %cst_91 {dimension_numbers = #tpu.dot_dimension_numbers<[1], [0], [0], [1], [0, 0, 1, 1], [], []>} : vector<256x4xf32>, vector<4x8xf32>, vector<256x8xf32> -> vector<256x8xf32>
    %68 = arith.addf %51, %67 : vector<256x8xf32>
    %c0_92 = arith.constant 0 : index
    %c3_93 = arith.constant 3 : index
    %c0_94 = arith.constant 0 : index
    %c0_95 = arith.constant 0 : index
    %c0_96 = arith.constant 0 : index
    %69 = vector.load %arg1[%c0_92, %c3_93, %c0_94, %c0_95, %c0_96] : memref<1x4x9x9x4xf32, #tpu.memory_space<vmem>>, vector<1x1x8x8x4xf32>
    %70 = vector.shape_cast %69 : vector<1x1x8x8x4xf32> to vector<8x8x4xf32>
    %71 = vector.shape_cast %70 : vector<8x8x4xf32> to vector<64x4xf32>
    %c0_97 = arith.constant 0 : index
    %c2_98 = arith.constant 2 : index
    %c0_99 = arith.constant 0 : index
    %c1_100 = arith.constant 1 : index
    %c0_101 = arith.constant 0 : index
    %72 = vector.load %arg1[%c0_97, %c2_98, %c0_99, %c1_100, %c0_101] : memref<1x4x9x9x4xf32, #tpu.memory_space<vmem>>, vector<1x1x8x8x4xf32>
    %73 = vector.shape_cast %72 : vector<1x1x8x8x4xf32> to vector<8x8x4xf32>
    %74 = vector.shape_cast %73 : vector<8x8x4xf32> to vector<64x4xf32>
    %c0_102 = arith.constant 0 : index
    %c1_103 = arith.constant 1 : index
    %c1_104 = arith.constant 1 : index
    %c0_105 = arith.constant 0 : index
    %c0_106 = arith.constant 0 : index
    %75 = vector.load %arg1[%c0_102, %c1_103, %c1_104, %c0_105, %c0_106] : memref<1x4x9x9x4xf32, #tpu.memory_space<vmem>>, vector<1x1x8x8x4xf32>
    %76 = vector.shape_cast %75 : vector<1x1x8x8x4xf32> to vector<8x8x4xf32>
    %77 = vector.shape_cast %76 : vector<8x8x4xf32> to vector<64x4xf32>
    %c0_107 = arith.constant 0 : index
    %c0_108 = arith.constant 0 : index
    %c1_109 = arith.constant 1 : index
    %c1_110 = arith.constant 1 : index
    %c0_111 = arith.constant 0 : index
    %78 = vector.load %arg1[%c0_107, %c0_108, %c1_109, %c1_110, %c0_111] : memref<1x4x9x9x4xf32, #tpu.memory_space<vmem>>, vector<1x1x8x8x4xf32>
    %79 = vector.shape_cast %78 : vector<1x1x8x8x4xf32> to vector<8x8x4xf32>
    %80 = vector.shape_cast %79 : vector<8x8x4xf32> to vector<64x4xf32>
    %81 = tpu.concatenate %71, %74, %77, %80 in 0 : vector<64x4xf32>, vector<64x4xf32>, vector<64x4xf32>, vector<64x4xf32> -> vector<256x4xf32>
    %c4 = arith.constant 4 : index
    %c0_112 = arith.constant 0 : index
    %c0_113 = arith.constant 0 : index
    %82 = vector.load %arg2[%c4, %c0_112, %c0_113] : memref<9x4x8xf32, #tpu.memory_space<vmem>>, vector<1x4x8xf32>
    %83 = vector.shape_cast %82 : vector<1x4x8xf32> to vector<4x8xf32>
    %cst_114 = arith.constant dense<0.000000e+00> : vector<256x8xf32>
    %84 = tpu.matmul %81, %83, %cst_114 {dimension_numbers = #tpu.dot_dimension_numbers<[1], [0], [0], [1], [0, 0, 1, 1], [], []>} : vector<256x4xf32>, vector<4x8xf32>, vector<256x8xf32> -> vector<256x8xf32>
    %85 = arith.addf %68, %84 : vector<256x8xf32>
    %c0_115 = arith.constant 0 : index
    %c2_116 = arith.constant 2 : index
    %c0_117 = arith.constant 0 : index
    %c1_118 = arith.constant 1 : index
    %c0_119 = arith.constant 0 : index
    %86 = vector.load %arg1[%c0_115, %c2_116, %c0_117, %c1_118, %c0_119] : memref<1x4x9x9x4xf32, #tpu.memory_space<vmem>>, vector<1x1x8x8x4xf32>
    %87 = vector.shape_cast %86 : vector<1x1x8x8x4xf32> to vector<8x8x4xf32>
    %88 = vector.shape_cast %87 : vector<8x8x4xf32> to vector<64x4xf32>
    %c0_120 = arith.constant 0 : index
    %c3_121 = arith.constant 3 : index
    %c0_122 = arith.constant 0 : index
    %c1_123 = arith.constant 1 : index
    %c0_124 = arith.constant 0 : index
    %89 = vector.load %arg1[%c0_120, %c3_121, %c0_122, %c1_123, %c0_124] : memref<1x4x9x9x4xf32, #tpu.memory_space<vmem>>, vector<1x1x8x8x4xf32>
    %90 = vector.shape_cast %89 : vector<1x1x8x8x4xf32> to vector<8x8x4xf32>
    %91 = vector.shape_cast %90 : vector<8x8x4xf32> to vector<64x4xf32>
    %c0_125 = arith.constant 0 : index
    %c0_126 = arith.constant 0 : index
    %c1_127 = arith.constant 1 : index
    %c1_128 = arith.constant 1 : index
    %c0_129 = arith.constant 0 : index
    %92 = vector.load %arg1[%c0_125, %c0_126, %c1_127, %c1_128, %c0_129] : memref<1x4x9x9x4xf32, #tpu.memory_space<vmem>>, vector<1x1x8x8x4xf32>
    %93 = vector.shape_cast %92 : vector<1x1x8x8x4xf32> to vector<8x8x4xf32>
    %94 = vector.shape_cast %93 : vector<8x8x4xf32> to vector<64x4xf32>
    %c0_130 = arith.constant 0 : index
    %c1_131 = arith.constant 1 : index
    %c1_132 = arith.constant 1 : index
    %c1_133 = arith.constant 1 : index
    %c0_134 = arith.constant 0 : index
    %95 = vector.load %arg1[%c0_130, %c1_131, %c1_132, %c1_133, %c0_134] : memref<1x4x9x9x4xf32, #tpu.memory_space<vmem>>, vector<1x1x8x8x4xf32>
    %96 = vector.shape_cast %95 : vector<1x1x8x8x4xf32> to vector<8x8x4xf32>
    %97 = vector.shape_cast %96 : vector<8x8x4xf32> to vector<64x4xf32>
    %98 = tpu.concatenate %88, %91, %94, %97 in 0 : vector<64x4xf32>, vector<64x4xf32>, vector<64x4xf32>, vector<64x4xf32> -> vector<256x4xf32>
    %c5 = arith.constant 5 : index
    %c0_135 = arith.constant 0 : index
    %c0_136 = arith.constant 0 : index
    %99 = vector.load %arg2[%c5, %c0_135, %c0_136] : memref<9x4x8xf32, #tpu.memory_space<vmem>>, vector<1x4x8xf32>
    %100 = vector.shape_cast %99 : vector<1x4x8xf32> to vector<4x8xf32>
    %cst_137 = arith.constant dense<0.000000e+00> : vector<256x8xf32>
    %101 = tpu.matmul %98, %100, %cst_137 {dimension_numbers = #tpu.dot_dimension_numbers<[1], [0], [0], [1], [0, 0, 1, 1], [], []>} : vector<256x4xf32>, vector<4x8xf32>, vector<256x8xf32> -> vector<256x8xf32>
    %102 = arith.addf %85, %101 : vector<256x8xf32>
    %c0_138 = arith.constant 0 : index
    %c0_139 = arith.constant 0 : index
    %c1_140 = arith.constant 1 : index
    %c0_141 = arith.constant 0 : index
    %c0_142 = arith.constant 0 : index
    %103 = vector.load %arg1[%c0_138, %c0_139, %c1_140, %c0_141, %c0_142] : memref<1x4x9x9x4xf32, #tpu.memory_space<vmem>>, vector<1x1x8x8x4xf32>
    %104 = vector.shape_cast %103 : vector<1x1x8x8x4xf32> to vector<8x8x4xf32>
    %105 = vector.shape_cast %104 : vector<8x8x4xf32> to vector<64x4xf32>
    %c0_143 = arith.constant 0 : index
    %c1_144 = arith.constant 1 : index
    %c1_145 = arith.constant 1 : index
    %c0_146 = arith.constant 0 : index
    %c0_147 = arith.constant 0 : index
    %106 = vector.load %arg1[%c0_143, %c1_144, %c1_145, %c0_146, %c0_147] : memref<1x4x9x9x4xf32, #tpu.memory_space<vmem>>, vector<1x1x8x8x4xf32>
    %107 = vector.shape_cast %106 : vector<1x1x8x8x4xf32> to vector<8x8x4xf32>
    %108 = vector.shape_cast %107 : vector<8x8x4xf32> to vector<64x4xf32>
    %c0_148 = arith.constant 0 : index
    %c2_149 = arith.constant 2 : index
    %c1_150 = arith.constant 1 : index
    %c0_151 = arith.constant 0 : index
    %c0_152 = arith.constant 0 : index
    %109 = vector.load %arg1[%c0_148, %c2_149, %c1_150, %c0_151, %c0_152] : memref<1x4x9x9x4xf32, #tpu.memory_space<vmem>>, vector<1x1x8x8x4xf32>
    %110 = vector.shape_cast %109 : vector<1x1x8x8x4xf32> to vector<8x8x4xf32>
    %111 = vector.shape_cast %110 : vector<8x8x4xf32> to vector<64x4xf32>
    %c0_153 = arith.constant 0 : index
    %c3_154 = arith.constant 3 : index
    %c1_155 = arith.constant 1 : index
    %c0_156 = arith.constant 0 : index
    %c0_157 = arith.constant 0 : index
    %112 = vector.load %arg1[%c0_153, %c3_154, %c1_155, %c0_156, %c0_157] : memref<1x4x9x9x4xf32, #tpu.memory_space<vmem>>, vector<1x1x8x8x4xf32>
    %113 = vector.shape_cast %112 : vector<1x1x8x8x4xf32> to vector<8x8x4xf32>
    %114 = vector.shape_cast %113 : vector<8x8x4xf32> to vector<64x4xf32>
    %115 = tpu.concatenate %105, %108, %111, %114 in 0 : vector<64x4xf32>, vector<64x4xf32>, vector<64x4xf32>, vector<64x4xf32> -> vector<256x4xf32>
    %c6 = arith.constant 6 : index
    %c0_158 = arith.constant 0 : index
    %c0_159 = arith.constant 0 : index
    %116 = vector.load %arg2[%c6, %c0_158, %c0_159] : memref<9x4x8xf32, #tpu.memory_space<vmem>>, vector<1x4x8xf32>
    %117 = vector.shape_cast %116 : vector<1x4x8xf32> to vector<4x8xf32>
    %cst_160 = arith.constant dense<0.000000e+00> : vector<256x8xf32>
    %118 = tpu.matmul %115, %117, %cst_160 {dimension_numbers = #tpu.dot_dimension_numbers<[1], [0], [0], [1], [0, 0, 1, 1], [], []>} : vector<256x4xf32>, vector<4x8xf32>, vector<256x8xf32> -> vector<256x8xf32>
    %119 = arith.addf %102, %118 : vector<256x8xf32>
    %c0_161 = arith.constant 0 : index
    %c1_162 = arith.constant 1 : index
    %c1_163 = arith.constant 1 : index
    %c0_164 = arith.constant 0 : index
    %c0_165 = arith.constant 0 : index
    %120 = vector.load %arg1[%c0_161, %c1_162, %c1_163, %c0_164, %c0_165] : memref<1x4x9x9x4xf32, #tpu.memory_space<vmem>>, vector<1x1x8x8x4xf32>
    %121 = vector.shape_cast %120 : vector<1x1x8x8x4xf32> to vector<8x8x4xf32>
    %122 = vector.shape_cast %121 : vector<8x8x4xf32> to vector<64x4xf32>
    %c0_166 = arith.constant 0 : index
    %c0_167 = arith.constant 0 : index
    %c1_168 = arith.constant 1 : index
    %c1_169 = arith.constant 1 : index
    %c0_170 = arith.constant 0 : index
    %123 = vector.load %arg1[%c0_166, %c0_167, %c1_168, %c1_169, %c0_170] : memref<1x4x9x9x4xf32, #tpu.memory_space<vmem>>, vector<1x1x8x8x4xf32>
    %124 = vector.shape_cast %123 : vector<1x1x8x8x4xf32> to vector<8x8x4xf32>
    %125 = vector.shape_cast %124 : vector<8x8x4xf32> to vector<64x4xf32>
    %c0_171 = arith.constant 0 : index
    %c3_172 = arith.constant 3 : index
    %c1_173 = arith.constant 1 : index
    %c0_174 = arith.constant 0 : index
    %c0_175 = arith.constant 0 : index
    %126 = vector.load %arg1[%c0_171, %c3_172, %c1_173, %c0_174, %c0_175] : memref<1x4x9x9x4xf32, #tpu.memory_space<vmem>>, vector<1x1x8x8x4xf32>
    %127 = vector.shape_cast %126 : vector<1x1x8x8x4xf32> to vector<8x8x4xf32>
    %128 = vector.shape_cast %127 : vector<8x8x4xf32> to vector<64x4xf32>
    %c0_176 = arith.constant 0 : index
    %c2_177 = arith.constant 2 : index
    %c1_178 = arith.constant 1 : index
    %c1_179 = arith.constant 1 : index
    %c0_180 = arith.constant 0 : index
    %129 = vector.load %arg1[%c0_176, %c2_177, %c1_178, %c1_179, %c0_180] : memref<1x4x9x9x4xf32, #tpu.memory_space<vmem>>, vector<1x1x8x8x4xf32>
    %130 = vector.shape_cast %129 : vector<1x1x8x8x4xf32> to vector<8x8x4xf32>
    %131 = vector.shape_cast %130 : vector<8x8x4xf32> to vector<64x4xf32>
    %132 = tpu.concatenate %122, %125, %128, %131 in 0 : vector<64x4xf32>, vector<64x4xf32>, vector<64x4xf32>, vector<64x4xf32> -> vector<256x4xf32>
    %c7 = arith.constant 7 : index
    %c0_181 = arith.constant 0 : index
    %c0_182 = arith.constant 0 : index
    %133 = vector.load %arg2[%c7, %c0_181, %c0_182] : memref<9x4x8xf32, #tpu.memory_space<vmem>>, vector<1x4x8xf32>
    %134 = vector.shape_cast %133 : vector<1x4x8xf32> to vector<4x8xf32>
    %cst_183 = arith.constant dense<0.000000e+00> : vector<256x8xf32>
    %135 = tpu.matmul %132, %134, %cst_183 {dimension_numbers = #tpu.dot_dimension_numbers<[1], [0], [0], [1], [0, 0, 1, 1], [], []>} : vector<256x4xf32>, vector<4x8xf32>, vector<256x8xf32> -> vector<256x8xf32>
    %136 = arith.addf %119, %135 : vector<256x8xf32>
    %c0_184 = arith.constant 0 : index
    %c0_185 = arith.constant 0 : index
    %c1_186 = arith.constant 1 : index
    %c1_187 = arith.constant 1 : index
    %c0_188 = arith.constant 0 : index
    %137 = vector.load %arg1[%c0_184, %c0_185, %c1_186, %c1_187, %c0_188] : memref<1x4x9x9x4xf32, #tpu.memory_space<vmem>>, vector<1x1x8x8x4xf32>
    %138 = vector.shape_cast %137 : vector<1x1x8x8x4xf32> to vector<8x8x4xf32>
    %139 = vector.shape_cast %138 : vector<8x8x4xf32> to vector<64x4xf32>
    %c0_189 = arith.constant 0 : index
    %c1_190 = arith.constant 1 : index
    %c1_191 = arith.constant 1 : index
    %c1_192 = arith.constant 1 : index
    %c0_193 = arith.constant 0 : index
    %140 = vector.load %arg1[%c0_189, %c1_190, %c1_191, %c1_192, %c0_193] : memref<1x4x9x9x4xf32, #tpu.memory_space<vmem>>, vector<1x1x8x8x4xf32>
    %141 = vector.shape_cast %140 : vector<1x1x8x8x4xf32> to vector<8x8x4xf32>
    %142 = vector.shape_cast %141 : vector<8x8x4xf32> to vector<64x4xf32>
    %c0_194 = arith.constant 0 : index
    %c2_195 = arith.constant 2 : index
    %c1_196 = arith.constant 1 : index
    %c1_197 = arith.constant 1 : index
    %c0_198 = arith.constant 0 : index
    %143 = vector.load %arg1[%c0_194, %c2_195, %c1_196, %c1_197, %c0_198] : memref<1x4x9x9x4xf32, #tpu.memory_space<vmem>>, vector<1x1x8x8x4xf32>
    %144 = vector.shape_cast %143 : vector<1x1x8x8x4xf32> to vector<8x8x4xf32>
    %145 = vector.shape_cast %144 : vector<8x8x4xf32> to vector<64x4xf32>
    %c0_199 = arith.constant 0 : index
    %c3_200 = arith.constant 3 : index
    %c1_201 = arith.constant 1 : index
    %c1_202 = arith.constant 1 : index
    %c0_203 = arith.constant 0 : index
    %146 = vector.load %arg1[%c0_199, %c3_200, %c1_201, %c1_202, %c0_203] : memref<1x4x9x9x4xf32, #tpu.memory_space<vmem>>, vector<1x1x8x8x4xf32>
    %147 = vector.shape_cast %146 : vector<1x1x8x8x4xf32> to vector<8x8x4xf32>
    %148 = vector.shape_cast %147 : vector<8x8x4xf32> to vector<64x4xf32>
    %149 = tpu.concatenate %139, %142, %145, %148 in 0 : vector<64x4xf32>, vector<64x4xf32>, vector<64x4xf32>, vector<64x4xf32> -> vector<256x4xf32>
    %c8 = arith.constant 8 : index
    %c0_204 = arith.constant 0 : index
    %c0_205 = arith.constant 0 : index
    %150 = vector.load %arg2[%c8, %c0_204, %c0_205] : memref<9x4x8xf32, #tpu.memory_space<vmem>>, vector<1x4x8xf32>
    %151 = vector.shape_cast %150 : vector<1x4x8xf32> to vector<4x8xf32>
    %cst_206 = arith.constant dense<0.000000e+00> : vector<256x8xf32>
    %152 = tpu.matmul %149, %151, %cst_206 {dimension_numbers = #tpu.dot_dimension_numbers<[1], [0], [0], [1], [0, 0, 1, 1], [], []>} : vector<256x4xf32>, vector<4x8xf32>, vector<256x8xf32> -> vector<256x8xf32>
    %153 = arith.addf %136, %152 : vector<256x8xf32>
    %154 = vector.extract_strided_slice %153 {offsets = [0, 0], sizes = [64, 8], strides = [1, 1]} : vector<256x8xf32> to vector<64x8xf32>
    %155 = vector.extract_strided_slice %153 {offsets = [64, 0], sizes = [64, 8], strides = [1, 1]} : vector<256x8xf32> to vector<64x8xf32>
    %156 = arith.maximumf %154, %155 : vector<64x8xf32>
    %157 = vector.extract_strided_slice %153 {offsets = [128, 0], sizes = [64, 8], strides = [1, 1]} : vector<256x8xf32> to vector<64x8xf32>
    %158 = vector.extract_strided_slice %153 {offsets = [192, 0], sizes = [64, 8], strides = [1, 1]} : vector<256x8xf32> to vector<64x8xf32>
    %159 = arith.maximumf %157, %158 : vector<64x8xf32>
    %160 = arith.maximumf %156, %159 : vector<64x8xf32>
    %c0_207 = arith.constant 0 : index
    %c0_208 = arith.constant 0 : index
    %161 = vector.load %arg3[%c0_207, %c0_208] : memref<1x8xf32, #tpu.memory_space<vmem>>, vector<1x8xf32>
    %162 = vector.broadcast %161 : vector<1x8xf32> to vector<64x8xf32>
    %163 = arith.addf %160, %162 : vector<64x8xf32>
    %cst_209 = arith.constant 0.000000e+00 : f32
    %164 = vector.broadcast %cst_209 : f32 to vector<64x8xf32>
    %165 = arith.cmpf ogt, %163, %164 : vector<64x8xf32>
    %cst_210 = arith.constant 0.00999999977 : f32
    %166 = vector.broadcast %cst_210 : f32 to vector<64x8xf32>
    %167 = arith.mulf %166, %163 : vector<64x8xf32>
    %168 = arith.select %165, %163, %167 : vector<64x8xi1>, vector<64x8xf32>
    %c0_211 = arith.constant 0 : index
    %c0_212 = arith.constant 0 : index
    %169 = vector.load %arg4[%c0_211, %c0_212] : memref<1x8xf32, #tpu.memory_space<vmem>>, vector<1x8xf32>
    %170 = vector.broadcast %169 : vector<1x8xf32> to vector<64x8xf32>
    %171 = arith.mulf %168, %170 : vector<64x8xf32>
    %c0_213 = arith.constant 0 : index
    %c0_214 = arith.constant 0 : index
    %172 = vector.load %arg5[%c0_213, %c0_214] : memref<1x8xf32, #tpu.memory_space<vmem>>, vector<1x8xf32>
    %173 = vector.broadcast %172 : vector<1x8xf32> to vector<64x8xf32>
    %174 = arith.addf %171, %173 : vector<64x8xf32>
    %c0_215 = arith.constant 0 : index
    %c0_216 = arith.constant 0 : index
    %c0_217 = arith.constant 0 : index
    %175 = vector.load %arg6[%c0_215, %c0_216, %c0_217] : memref<1x64x8xf32, #tpu.memory_space<vmem>>, vector<1x64x8xf32>
    %176 = vector.shape_cast %175 : vector<1x64x8xf32> to vector<64x8xf32>
    %177 = vector.shape_cast %174 : vector<64x8xf32> to vector<1x64x8xf32>
    tpu.vector_store %arg6[%c0_215, %c0_216, %c0_217], %177 {strides = array<i32>} : memref<1x64x8xf32, #tpu.memory_space<vmem>>, vector<1x64x8xf32>,
    return
  }
  func.func @transform_0(%arg0: i32) -> (i32, i32, i32, i32, i32) {
    %c0_i32 = arith.constant 0 : i32
    %c0_i32_0 = arith.constant 0 : i32
    %c0_i32_1 = arith.constant 0 : i32
    %c0_i32_2 = arith.constant 0 : i32
    %c0_i32_3 = arith.constant 0 : i32
    return %arg0, %c0_i32, %c0_i32_0, %c0_i32_1, %c0_i32_2 : i32, i32, i32, i32, i32
  }
  func.func @transform_1(%arg0: i32) -> (i32, i32, i32) {
    %c0_i32 = arith.constant 0 : i32
    %c0_i32_0 = arith.constant 0 : i32
    %c0_i32_1 = arith.constant 0 : i32
    %c0_i32_2 = arith.constant 0 : i32
    return %c0_i32, %c0_i32_0, %c0_i32_1 : i32, i32, i32
  }
  func.func @transform_2(%arg0: i32) -> (i32, i32) {
    %c0_i32 = arith.constant 0 : i32
    %c0_i32_0 = arith.constant 0 : i32
    %c0_i32_1 = arith.constant 0 : i32
    return %c0_i32, %c0_i32_0 : i32, i32
  }
  func.func @transform_3(%arg0: i32) -> (i32, i32) {
    %c0_i32 = arith.constant 0 : i32
    %c0_i32_0 = arith.constant 0 : i32
    %c0_i32_1 = arith.constant 0 : i32
    return %c0_i32, %c0_i32_0 : i32, i32
  }
  func.func @transform_4(%arg0: i32) -> (i32, i32) {
    %c0_i32 = arith.constant 0 : i32
    %c0_i32_0 = arith.constant 0 : i32
    %c0_i32_1 = arith.constant 0 : i32
    return %c0_i32, %c0_i32_0 : i32, i32
  }
  func.func @transform_5(%arg0: i32) -> (i32, i32, i32) {
    %c0_i32 = arith.constant 0 : i32
    %c0_i32_0 = arith.constant 0 : i32
    %c0_i32_1 = arith.constant 0 : i32
    return %arg0, %c0_i32, %c0_i32_0 : i32, i32, i32
  }
}

</mosaic_0001>

<bundles_post_ra>
// kernel: tpu_custom_call.1
= control target key start
LH: loop header
LB: loop body
LE: loop exit
PB: predicated region body
PF: predicated region fallthrough
CT: control target
= control target key end

     0   :  { %s4423_s18 = smov 0   ;;  %s5818_s0 = inlined_call_operand.vmem [shape: f32[2,4,9,9,4], index: 0, kind: input, shape index: {}]   ;;  %s5819_s1 = inlined_call_operand.vmem [shape: f32[9,4,8], index: 1, kind: input, shape index: {}]   ;;  %s5820_s2 = inlined_call_operand.vmem [shape: f32[1,8], index: 2, kind: input, shape index: {}]   ;;  %s5821_s3 = inlined_call_operand.vmem [shape: f32[1,8], index: 3, kind: input, shape index: {}]   ;;  %s5822_s4 = inlined_call_operand.vmem [shape: f32[1,8], index: 4, kind: input, shape index: {}]   ;;  %s5823_s5 = inlined_call_operand.vmem [shape: f32[2,64,8], index: 5, kind: output, shape index: {}]  }
   0x1 LB: > { %s3196_s19 = sadd.s32 4294967295, %s4391_s18   ;;  %p3200_p0 = scmp.ge.s32.totalorder %s4391_s18, 1  ;;  %s4391_s18 = sphi %s4423_s18, %s15_s18  }
   0x2   : > { %p187_p1 = scmp.lt.s32.totalorder %s4391_s18, 3 }
   0x4   : > { %p188_p2 = pnand %p3200_p0, %p187_p1 }
   0x6   : > { %191 = sbr.rel (%p188_p2) target bundleno = 521 (0x209), region = 40 }
   0xb   : > { %v3236_v0 = vld [vmem:[%s5819_s1 + $0x4] sm:$0xf]  ;;  %vm376_vm0 = vcmask 1043456   ;;  %p215_p3 = scmp.lt.s32.totalorder %s3196_s19, 1  ;;  %v260_v1 = vld [vmem:[%s5819_s1] sm:$0xf] }
   0xc   : > { %4374 = vmatprep.subr.msk.mxu1 %vm376_vm0, %v3236_v0  ;;  %3924 = vmatprep.subr.msk.mxu0 %vm376_vm0, %v3236_v0  ;;  %v3319_v2 = vld [vmem:[%s5819_s1 + $0x8] sm:$0xf]  ;;  %vm279_vm1 = vcmask 31744   ;;  %v4483_v9 = vld [vmem:[%s5819_s1 + $0xc] sm:$0xf]  ;;  %vm3132_vm2 = vcmask 64512  }
   0xd   : > { %4375 = vmatpush3.msk.msra.mxu1 %vm376_vm0, %v3236_v0  ;;  %3925 = vmatpush3.msk.msra.mxu0 %vm376_vm0, %v3236_v0  ;;  %s5907_s19 = smov (!%p215_p3, %s3196_s19), 1  ;;  %v4488_v10 = vld [vmem:[%s5819_s1 + $0x10] sm:$0xf]  ;;  %v4643_v40 = vld [vmem:[%s5819_s1 + $0x14] sm:$0xf] }
   0xe   : > { %3974 = vmatprep.subr.msk.mxu1 %vm376_vm0, %v260_v1  ;;  %4024 = vmatprep.subr.msk.mxu0 %vm376_vm0, %v3319_v2  ;;  %s4376_s26 = smul.u32 576, %s5907_s19  ;;  %v4648_v41 = vld [vmem:[%s5819_s1 + $0x18] sm:$0xf]  ;;  %s3626_s23 = sshll.u32 %s5907_s19, 6 }
   0xf   : > { %s5763_s27 = scalar_lea.vmem %s5823_s5, %s3626_s23 }
  0x10   : > { %s4452_s29 = scalar_lea.vmem %s5818_s0, %s4376_s26 }
  0x11   : > { %v4455_v3 = vld [vmem:[%s4452_s29 + $0x90] sm:$0xff]  ;;  %v4461_v5 = vld [vmem:[%s4452_s29 + $0xa0] sm:$0xff] }
  0x12   : > { %v4458_v4 = vld [vmem:[%s4452_s29 + $0x1b0] sm:$0xff]  ;;  %3926 = vmatprep.mubr.msk.f32.mxu0 %vm279_vm1, %v4455_v3  ;;  %v4468_v6 = vld [vmem:[%s4452_s29 + $0x1c0] sm:$0xff] }
  0x13   : > { %3950 = vmatprep.mubr.msk.f32.mxu1 %vm279_vm1, %v4458_v4  ;;  %v4471_v7 = vld [vmem:[%s4452_s29 + $0xb0] sm:$0xff]  ;;  %3927 = vmatmul.mubr.msk.f32.vlgmr.msra.gmra.mxu0 %vm279_vm1, %v4461_v5  ;;  %v4493_v11 = vld [vmem:[%s4452_s29 + $0xc0] sm:$0xff] }
  0x14   : > { %v4474_v8 = vld [vmem:[%s4452_s29 + $0x1d0] sm:$0xff]  ;;  %3951 = vmatmul.mubr.msk.f32.vlgmr.msra.gmra.mxu1 %vm279_vm1, %v4468_v6  ;;  %4025 = vmatpush3.msk.msra.mxu0 %vm376_vm0, %v3319_v2  ;;  %v4496_v12 = vld [vmem:[%s4452_s29 + $0x1e0] sm:$0xff] }
  0x15   : > { %3975 = vmatpush3.msk.msra.mxu1 %vm376_vm0, %v260_v1  ;;  %3929 = vmatprep.mubr.msk.f32.mxu0 %vm279_vm1, %v4471_v7  ;;  %v4503_v13 = vld [vmem:[%s4452_s29 + $0xd0] sm:$0xff]  ;;  %v4521_v15 = vld [vmem:[%s4452_s29 + $0xe0] sm:$0xff] }
  0x16   : > { %3953 = vmatprep.mubr.msk.f32.mxu1 %vm279_vm1, %v4474_v8  ;;  %v4506_v14 = vld [vmem:[%s4452_s29 + $0x1f0] sm:$0xff]  ;;  %4074 = vmatprep.subr.msk.mxu1 %vm376_vm0, %v4483_v9  ;;  %v4524_v16 = vld [vmem:[%s4452_s29 + $0x200] sm:$0xff] }
  0x17   : > { %4124 = vmatprep.subr.msk.mxu0 %vm376_vm0, %v4488_v10  ;;  %3930 = vmatmul.mubr.msk.f32.gmra.mxu0 %vm279_vm1, %v4493_v11  ;;  %v4527_v17 = vld [vmem:[%s4452_s29 + $0xf0] sm:$0xff]  ;;  %v4541_v19 = vld [vmem:[%s4452_s29 + $0x100] sm:$0xff] }
  0x18   : > { %3954 = vmatmul.mubr.msk.f32.gmra.mxu1 %vm279_vm1, %v4496_v12  ;;  %3932 = vmatprep.mubr.msk.f32.mxu0 %vm279_vm1, %v4503_v13  ;;  %v4530_v18 = vld [vmem:[%s4452_s29 + $0x210] sm:$0xff]  ;;  %v4544_v20 = vld [vmem:[%s4452_s29 + $0x220] sm:$0xff] }
  0x19   : > { %3956 = vmatprep.mubr.msk.f32.mxu1 %vm279_vm1, %v4506_v14  ;;  %5835 = vst [vmem:[#allocation2_spill] sm:$0xff] %v4544_v20  ;;  %v261_v21 = vld [vmem:[%s4452_s29 + $0x1] sm:$0xff]  ;;  %v4558_v23 = vld [vmem:[%s4452_s29 + $0x11] sm:$0xff] }
  0x1a   : > { %v4548_v22 = vld [vmem:[%s4452_s29 + $0x121] sm:$0xff]  ;;  %v4561_v24 = vld [vmem:[%s4452_s29 + $0x131] sm:$0xff] }
  0x1b   : > { %3933 = vmatmul.mubr.msk.f32.gmra.mxu0 %vm279_vm1, %v4521_v15  ;;  %v4564_v25 = vld [vmem:[%s4452_s29 + $0x21] sm:$0xff]  ;;  %v4578_v27 = vld [vmem:[%s4452_s29 + $0x31] sm:$0xff] }
  0x1c   : > { %3957 = vmatmul.mubr.msk.f32.gmra.mxu1 %vm279_vm1, %v4524_v16  ;;  %3935 = vmatprep.mubr.msk.f32.mxu0 %vm279_vm1, %v4527_v17  ;;  %v4567_v26 = vld [vmem:[%s4452_s29 + $0x141] sm:$0xff]  ;;  %v4581_v28 = vld [vmem:[%s4452_s29 + $0x151] sm:$0xff] }
  0x1d   : > { %3959 = vmatprep.mubr.msk.f32.mxu1 %vm279_vm1, %v4530_v18  ;;  %v4584_v29 = vld [vmem:[%s4452_s29 + $0x41] sm:$0xff]  ;;  %v4598_v31 = vld [vmem:[%s4452_s29 + $0x51] sm:$0xff] }
  0x1e   : > { %v4587_v30 = vld [vmem:[%s4452_s29 + $0x161] sm:$0xff]  ;;  %v4601_v32 = vld [vmem:[%s4452_s29 + $0x171] sm:$0xff] }
  0x1f   : > { %3936 = vmatmul.mubr.msk.f32.gmra.mxu0 %vm279_vm1, %v4541_v19  ;;  %v4604_v33 = vld [vmem:[%s4452_s29 + $0x61] sm:$0xff]  ;;  %v4618_v35 = vld [vmem:[%s4452_s29 + $0x71] sm:$0xff] }
  0x20   : > { %3960 = vmatmul.mubr.msk.f32.gmra.mxu1 %vm279_vm1, %v4544_v20  ;;  %3938 = vmatprep.mubr.msk.f32.mxu0 %vm279_vm1, %v261_v21  ;;  %v4607_v34 = vld [vmem:[%s4452_s29 + $0x181] sm:$0xff]  ;;  %v4621_v36 = vld [vmem:[%s4452_s29 + $0x191] sm:$0xff] }
  0x21   : > { %3962 = vmatprep.mubr.msk.f32.mxu1 %vm279_vm1, %v4548_v22  ;;  %5836 = vst [vmem:[#allocation3_spill] sm:$0xff] %v4621_v36  ;;  %v225_v37 = vld [vmem:[%s4452_s29] sm:$0xff]  ;;  %v4631_v38 = vld [vmem:[%s4452_s29 + $0x10] sm:$0xff] }
  0x22   : > { %v4634_v39 = vld [vmem:[%s4452_s29 + $0x20] sm:$0xff]  ;;  %v4655_v42 = vld [vmem:[%s4452_s29 + $0x30] sm:$0xff] }
  0x23   : > { %3939 = vmatmul.mubr.msk.f32.gmra.mxu0 %vm279_vm1, %v4558_v23  ;;  %v4662_v43 = vld [vmem:[%s4452_s29 + $0x40] sm:$0xff]  ;;  %v4677_v44 = vld [vmem:[%s4452_s29 + $0x50] sm:$0xff] }
  0x24   : > { %3963 = vmatmul.mubr.msk.f32.gmra.mxu1 %vm279_vm1, %v4561_v24  ;;  %3941 = vmatprep.mubr.msk.f32.mxu0 %vm279_vm1, %v4564_v25  ;;  %v4680_v45 = vld [vmem:[%s4452_s29 + $0x60] sm:$0xff]  ;;  %v4691_v46 = vld [vmem:[%s4452_s29 + $0x70] sm:$0xff] }
  0x25   : > { %3965 = vmatprep.mubr.msk.f32.mxu1 %vm279_vm1, %v4567_v26  ;;  %v3303_v47 = vld [vmem:[%s4452_s29 + $0x91] sm:$0xff]  ;;  %v4702_v48 = vld [vmem:[%s4452_s29 + $0xa1] sm:$0xff] }
  0x26   : > { %v4705_v49 = vld [vmem:[%s4452_s29 + $0xb1] sm:$0xff]  ;;  %v4716_v50 = vld [vmem:[%s4452_s29 + $0xc1] sm:$0xff] }
  0x27   : > { %3942 = vmatmul.mubr.msk.f32.gmra.mxu0 %vm279_vm1, %v4578_v27  ;;  %v4719_v51 = vld [vmem:[%s4452_s29 + $0xd1] sm:$0xff]  ;;  %v4730_v52 = vld [vmem:[%s4452_s29 + $0xe1] sm:$0xff] }
  0x28   : > { %3966 = vmatmul.mubr.msk.f32.gmra.mxu1 %vm279_vm1, %v4581_v28  ;;  %3944 = vmatprep.mubr.msk.f32.mxu0 %vm279_vm1, %v4584_v29  ;;  %v4733_v53 = vld [vmem:[%s4452_s29 + $0xf1] sm:$0xff]  ;;  %v4744_v54 = vld [vmem:[%s4452_s29 + $0x101] sm:$0xff] }
  0x29   : > { %3968 = vmatprep.mubr.msk.f32.mxu1 %vm279_vm1, %v4587_v30  ;;  %v3212_v55 = vld [vmem:[%s4452_s29 + $0x120] sm:$0xff]  ;;  %v4755_v56 = vld [vmem:[%s4452_s29 + $0x130] sm:$0xff] }
  0x2a   : > { %v4758_v57 = vld [vmem:[%s4452_s29 + $0x140] sm:$0xff]  ;;  %v4769_v58 = vld [vmem:[%s4452_s29 + $0x150] sm:$0xff] }
  0x2b   : > { %3945 = vmatmul.mubr.msk.f32.gmra.mxu0 %vm279_vm1, %v4598_v31  ;;  %v4772_v59 = vld [vmem:[%s4452_s29 + $0x160] sm:$0xff]  ;;  %v4783_v60 = vld [vmem:[%s4452_s29 + $0x170] sm:$0xff] }
  0x2c   : > { %3969 = vmatmul.mubr.msk.f32.gmra.mxu1 %vm279_vm1, %v4601_v32  ;;  %3947 = vmatprep.mubr.msk.f32.mxu0 %vm279_vm1, %v4604_v33  ;;  %v4786_v61 = vld [vmem:[%s4452_s29 + $0x180] sm:$0xff]  ;;  %v4797_v62 = vld [vmem:[%s4452_s29 + $0x190] sm:$0xff] }
  0x2d   : > { %3971 = vmatprep.mubr.msk.f32.mxu1 %vm279_vm1, %v4607_v34  ;;  %v4800_v63 = vld [vmem:[%s4452_s29 + $0x1b1] sm:$0xff]  ;;  %v4811_v0 = vld [vmem:[%s4452_s29 + $0x1c1] sm:$0xff] }
  0x2e   : > { %5837 = vst [vmem:[#allocation4_spill] sm:$0xff] %v4811_v0  ;;  %v4814_v1 = vld [vmem:[%s4452_s29 + $0x1d1] sm:$0xff]  ;;  %v4825_v2 = vld [vmem:[%s4452_s29 + $0x1e1] sm:$0xff] }
  0x2f   : > { %3948 = vmatmul.mubr.msk.f32.gmra.mxu0 %vm279_vm1, %v4618_v35  ;;  %5838 = vst [vmem:[#allocation5_spill] sm:$0xff] %v4814_v1  ;;  %5839 = vst [vmem:[#allocation6_spill] sm:$0xff] %v4825_v2 }
  0x30   : > { %3972 = vmatmul.mubr.msk.f32.gmra.mxu1 %vm279_vm1, %v4621_v36  ;;  %4026 = vmatprep.mubr.msk.f32.mxu0 %vm279_vm1, %v261_v21  ;;  %v4853_v21 = vld [vmem:[%s4452_s29 + $0x221] sm:$0xff] }
  0x31   : > { %3976 = vmatprep.mubr.msk.f32.mxu1 %vm279_vm1, %v225_v37  ;;  %5843 = vst [vmem:[#allocation10_spill] sm:$0xff] %v4853_v21  ;;  %v4869_v37 = vld [vmem:[%s5819_s1 + $0x1c] sm:$0xf] }
  0x33   : > { %4027 = vmatmul.mubr.msk.f32.vlgmr.msra.gmra.mxu0 %vm279_vm1, %v4558_v23 }
  0x34   : > { %3977 = vmatmul.mubr.msk.f32.vlgmr.msra.gmra.mxu1 %vm279_vm1, %v4631_v38  ;;  %4125 = vmatpush3.msk.msra.mxu0 %vm376_vm0, %v4488_v10  ;;  %v4842_v10 = vld [vmem:[%s4452_s29 + $0x211] sm:$0xff] }
  0x35   : > { %4075 = vmatpush3.msk.msra.mxu1 %vm376_vm0, %v4483_v9  ;;  %3979 = vmatprep.mubr.msk.f32.mxu1 %vm279_vm1, %v4634_v39  ;;  %v4839_v9 = vld [vmem:[%s4452_s29 + $0x201] sm:$0xff]  ;;  %5842 = vst [vmem:[#allocation9_spill] sm:$0xff] %v4842_v10 }
  0x36   : > { %4029 = vmatprep.mubr.msk.f32.mxu0 %vm279_vm1, %v4564_v25  ;;  %4174 = vmatprep.subr.msk.mxu1 %vm376_vm0, %v4643_v40  ;;  %5841 = vst [vmem:[#allocation8_spill] sm:$0xff] %v4839_v9 }
  0x37   : > { %4224 = vmatprep.subr.msk.mxu0 %vm376_vm0, %v4648_v41  ;;  %4030 = vmatmul.mubr.msk.f32.gmra.mxu0 %vm279_vm1, %v4578_v27 }
  0x38   : > { %3980 = vmatmul.mubr.msk.f32.gmra.mxu1 %vm279_vm1, %v4655_v42  ;;  %4032 = vmatprep.mubr.msk.f32.mxu0 %vm279_vm1, %v4584_v29 }
  0x39   : > { %3982 = vmatprep.mubr.msk.f32.mxu1 %vm279_vm1, %v4662_v43 }
  0x3b   : > { %4033 = vmatmul.mubr.msk.f32.gmra.mxu0 %vm279_vm1, %v4598_v31 }
  0x3c   : > { %3983 = vmatmul.mubr.msk.f32.gmra.mxu1 %vm279_vm1, %v4677_v44  ;;  %4035 = vmatprep.mubr.msk.f32.mxu0 %vm279_vm1, %v4604_v33 }
  0x3d   : > { %3985 = vmatprep.mubr.msk.f32.mxu1 %vm279_vm1, %v4680_v45 }
  0x3f   : > { %4036 = vmatmul.mubr.msk.f32.gmra.mxu0 %vm279_vm1, %v4618_v35 }
  0x40   : > { %3986 = vmatmul.mubr.msk.f32.gmra.mxu1 %vm279_vm1, %v4691_v46  ;;  %4038 = vmatprep.mubr.msk.f32.mxu0 %vm279_vm1, %v3303_v47  ;;  %v4874_v47 = vld [vmem:[%s5819_s1 + $0x20] sm:$0xf] }
  0x41   : > { %3988 = vmatprep.mubr.msk.f32.mxu1 %vm279_vm1, %v4455_v3  ;;  %v4828_v3 = vld [vmem:[%s4452_s29 + $0x1f1] sm:$0xff] }
  0x42   : > { %5840 = vst [vmem:[#allocation7_spill] sm:$0xff] %v4828_v3 }
  0x43   : > { %4039 = vmatmul.mubr.msk.f32.gmra.mxu0 %vm279_vm1, %v4702_v48 }
  0x44   : > { %3989 = vmatmul.mubr.msk.f32.gmra.mxu1 %vm279_vm1, %v4461_v5  ;;  %4041 = vmatprep.mubr.msk.f32.mxu0 %vm279_vm1, %v4705_v49 }
  0x45   : > { %3991 = vmatprep.mubr.msk.f32.mxu1 %vm279_vm1, %v4471_v7 }
  0x47   : > { %4042 = vmatmul.mubr.msk.f32.gmra.mxu0 %vm279_vm1, %v4716_v50 }
  0x48   : > { %3992 = vmatmul.mubr.msk.f32.gmra.mxu1 %vm279_vm1, %v4493_v11  ;;  %4044 = vmatprep.mubr.msk.f32.mxu0 %vm279_vm1, %v4719_v51 }
  0x49   : > { %3994 = vmatprep.mubr.msk.f32.mxu1 %vm279_vm1, %v4503_v13 }
  0x4b   : > { %4045 = vmatmul.mubr.msk.f32.gmra.mxu0 %vm279_vm1, %v4730_v52 }
  0x4c   : > { %3995 = vmatmul.mubr.msk.f32.gmra.mxu1 %vm279_vm1, %v4521_v15  ;;  %4047 = vmatprep.mubr.msk.f32.mxu0 %vm279_vm1, %v4733_v53 }
  0x4d   : > { %3997 = vmatprep.mubr.msk.f32.mxu1 %vm279_vm1, %v4527_v17 }
  0x4f   : > { %4048 = vmatmul.mubr.msk.f32.gmra.mxu0 %vm279_vm1, %v4744_v54 }
  0x50   : > { %3998 = vmatmul.mubr.msk.f32.gmra.mxu1 %vm279_vm1, %v4541_v19  ;;  %4050 = vmatprep.mubr.msk.f32.mxu0 %vm279_vm1, %v4548_v22 }
  0x51   : > { %4000 = vmatprep.mubr.msk.f32.mxu1 %vm279_vm1, %v3212_v55 }
  0x53   : > { %4051 = vmatmul.mubr.msk.f32.gmra.mxu0 %vm279_vm1, %v4561_v24 }
  0x54   : > { %4001 = vmatmul.mubr.msk.f32.gmra.mxu1 %vm279_vm1, %v4755_v56  ;;  %4053 = vmatprep.mubr.msk.f32.mxu0 %vm279_vm1, %v4567_v26 }
  0x55   : > { %4003 = vmatprep.mubr.msk.f32.mxu1 %vm279_vm1, %v4758_v57 }
  0x57   : > { %4054 = vmatmul.mubr.msk.f32.gmra.mxu0 %vm279_vm1, %v4581_v28 }
  0x58   : > { %4004 = vmatmul.mubr.msk.f32.gmra.mxu1 %vm279_vm1, %v4769_v58  ;;  %4056 = vmatprep.mubr.msk.f32.mxu0 %vm279_vm1, %v4587_v30 }
  0x59   : > { %4006 = vmatprep.mubr.msk.f32.mxu1 %vm279_vm1, %v4772_v59 }
  0x5b   : > { %4057 = vmatmul.mubr.msk.f32.gmra.mxu0 %vm279_vm1, %v4601_v32 }
  0x5c   : > { %4007 = vmatmul.mubr.msk.f32.gmra.mxu1 %vm279_vm1, %v4783_v60  ;;  %4059 = vmatprep.mubr.msk.f32.mxu0 %vm279_vm1, %v4607_v34 }
  0x5d   : > { %4009 = vmatprep.mubr.msk.f32.mxu1 %vm279_vm1, %v4786_v61 }
  0x5f   : > { %4060 = vmatmul.mubr.msk.f32.gmra.mxu0 %vm279_vm1, %v4621_v36 }
  0x60   : > { %4010 = vmatmul.mubr.msk.f32.gmra.mxu1 %vm279_vm1, %v4797_v62  ;;  %4062 = vmatprep.mubr.msk.f32.mxu0 %vm279_vm1, %v4800_v63 }
  0x61   : > { %4012 = vmatprep.mubr.msk.f32.mxu1 %vm279_vm1, %v4458_v4 }
  0x63   : > { %4063 = vmatmul.mubr.msk.f32.gmra.mxu0 %vm279_vm1, %v4811_v0 }
  0x64   : > { %4013 = vmatmul.mubr.msk.f32.gmra.mxu1 %vm279_vm1, %v4468_v6  ;;  %4065 = vmatprep.mubr.msk.f32.mxu0 %vm279_vm1, %v4814_v1 }
  0x65   : > { %4015 = vmatprep.mubr.msk.f32.mxu1 %vm279_vm1, %v4474_v8 }
  0x67   : > { %4066 = vmatmul.mubr.msk.f32.gmra.mxu0 %vm279_vm1, %v4825_v2 }
  0x68   : > { %4016 = vmatmul.mubr.msk.f32.gmra.mxu1 %vm279_vm1, %v4496_v12  ;;  %4068 = vmatprep.mubr.msk.f32.mxu0 %vm279_vm1, %v4828_v3 }
  0x69   : > { %4018 = vmatprep.mubr.msk.f32.mxu1 %vm279_vm1, %v4506_v14 }
  0x6b   : > { %4069 = vmatmul.mubr.msk.f32.gmra.mxu0 %vm279_vm1, %v4839_v9 }
  0x6c   : > { %4019 = vmatmul.mubr.msk.f32.gmra.mxu1 %vm279_vm1, %v4524_v16  ;;  %4071 = vmatprep.mubr.msk.f32.mxu0 %vm279_vm1, %v4842_v10 }
  0x6d   : > { %4021 = vmatprep.mubr.msk.f32.mxu1 %vm279_vm1, %v4530_v18 }
  0x6f   : > { %4072 = vmatmul.mubr.msk.f32.gmra.mxu0 %vm279_vm1, %v4853_v21 }
  0x70   : > { %4022 = vmatmul.mubr.msk.f32.gmra.mxu1 %vm279_vm1, %v4544_v20  ;;  %4126 = vmatprep.mubr.msk.f32.mxu0 %vm279_vm1, %v4458_v4 }
  0x71   : > { %4076 = vmatprep.mubr.msk.f32.mxu1 %vm279_vm1, %v3212_v55 }
  0x73   : > { %4127 = vmatmul.mubr.msk.f32.vlgmr.msra.gmra.mxu0 %vm279_vm1, %v4468_v6 }
  0x74   : > { %4077 = vmatmul.mubr.msk.f32.vlgmr.msra.gmra.mxu1 %vm279_vm1, %v4755_v56  ;;  %4225 = vmatpush3.msk.msra.mxu0 %vm376_vm0, %v4648_v41  ;;  %v5004_v41 = vld [vmem:[%s4452_s29 + $0x81] sm:$0xff] }
  0x75   : > { %4175 = vmatpush3.msk.msra.mxu1 %vm376_vm0, %v4643_v40  ;;  %4079 = vmatprep.mubr.msk.f32.mxu1 %vm279_vm1, %v4758_v57  ;;  %v4970_v40 = vld [vmem:[%s4452_s29 + $0x110] sm:$0xff] }
  0x76   : > { %4129 = vmatprep.mubr.msk.f32.mxu0 %vm279_vm1, %v4474_v8  ;;  %4274 = vmatprep.subr.msk.mxu1 %vm376_vm0, %v4869_v37 }
  0x77   : > { %4324 = vmatprep.subr.msk.mxu0 %vm376_vm0, %v4874_v47  ;;  %4130 = vmatmul.mubr.msk.f32.gmra.mxu0 %vm279_vm1, %v4496_v12 }
  0x78   : > { %4080 = vmatmul.mubr.msk.f32.gmra.mxu1 %vm279_vm1, %v4769_v58  ;;  %4132 = vmatprep.mubr.msk.f32.mxu0 %vm279_vm1, %v4506_v14 }
  0x79   : > { %4082 = vmatprep.mubr.msk.f32.mxu1 %vm279_vm1, %v4772_v59 }
  0x7b   : > { %4133 = vmatmul.mubr.msk.f32.gmra.mxu0 %vm279_vm1, %v4524_v16 }
  0x7c   : > { %4083 = vmatmul.mubr.msk.f32.gmra.mxu1 %vm279_vm1, %v4783_v60  ;;  %4135 = vmatprep.mubr.msk.f32.mxu0 %vm279_vm1, %v4530_v18 }
  0x7d   : > { %4085 = vmatprep.mubr.msk.f32.mxu1 %vm279_vm1, %v4786_v61 }
  0x7f   : > { %4136 = vmatmul.mubr.msk.f32.gmra.mxu0 %vm279_vm1, %v4544_v20 }
  0x80   : > { %4086 = vmatmul.mubr.msk.f32.gmra.mxu1 %vm279_vm1, %v4797_v62  ;;  %4138 = vmatprep.mubr.msk.f32.mxu0 %vm279_vm1, %v4548_v22 }
  0x81   : > { %4088 = vmatprep.mubr.msk.f32.mxu1 %vm279_vm1, %v4458_v4  ;;  %v3360_v4 = vld [vmem:[%s4452_s29 + $0x80] sm:$0xff] }
  0x83   : > { %4139 = vmatmul.mubr.msk.f32.gmra.mxu0 %vm279_vm1, %v4561_v24 }
  0x84   : > { %4089 = vmatmul.mubr.msk.f32.gmra.mxu1 %vm279_vm1, %v4468_v6  ;;  %4141 = vmatprep.mubr.msk.f32.mxu0 %vm279_vm1, %v4567_v26 }
  0x85   : > { %4091 = vmatprep.mubr.msk.f32.mxu1 %vm279_vm1, %v4474_v8 }
  0x87   : > { %4142 = vmatmul.mubr.msk.f32.gmra.mxu0 %vm279_vm1, %v4581_v28 }
  0x88   : > { %4092 = vmatmul.mubr.msk.f32.gmra.mxu1 %vm279_vm1, %v4496_v12  ;;  %4144 = vmatprep.mubr.msk.f32.mxu0 %vm279_vm1, %v4587_v30 }
  0x89   : > { %4094 = vmatprep.mubr.msk.f32.mxu1 %vm279_vm1, %v4506_v14 }
  0x8b   : > { %4145 = vmatmul.mubr.msk.f32.gmra.mxu0 %vm279_vm1, %v4601_v32 }
  0x8c   : > { %4095 = vmatmul.mubr.msk.f32.gmra.mxu1 %vm279_vm1, %v4524_v16  ;;  %4147 = vmatprep.mubr.msk.f32.mxu0 %vm279_vm1, %v4607_v34 }
  0x8d   : > { %4097 = vmatprep.mubr.msk.f32.mxu1 %vm279_vm1, %v4530_v18 }
  0x8f   : > { %4148 = vmatmul.mubr.msk.f32.gmra.mxu0 %vm279_vm1, %v4621_v36 }
  0x90   : > { %4098 = vmatmul.mubr.msk.f32.gmra.mxu1 %vm279_vm1, %v4544_v20  ;;  %4150 = vmatprep.mubr.msk.f32.mxu0 %vm279_vm1, %v4461_v5 }
  0x91   : > { %4100 = vmatprep.mubr.msk.f32.mxu1 %vm279_vm1, %v4631_v38 }
  0x93   : > { %4151 = vmatmul.mubr.msk.f32.gmra.mxu0 %vm279_vm1, %v4471_v7 }
  0x94   : > { %4101 = vmatmul.mubr.msk.f32.gmra.mxu1 %vm279_vm1, %v4634_v39  ;;  %4153 = vmatprep.mubr.msk.f32.mxu0 %vm279_vm1, %v4493_v11 }
  0x95   : > { %4103 = vmatprep.mubr.msk.f32.mxu1 %vm279_vm1, %v4655_v42 }
  0x97   : > { %4154 = vmatmul.mubr.msk.f32.gmra.mxu0 %vm279_vm1, %v4503_v13 }
  0x98   : > { %4104 = vmatmul.mubr.msk.f32.gmra.mxu1 %vm279_vm1, %v4662_v43  ;;  %4156 = vmatprep.mubr.msk.f32.mxu0 %vm279_vm1, %v4521_v15 }
  0x99   : > { %4106 = vmatprep.mubr.msk.f32.mxu1 %vm279_vm1, %v4677_v44 }
  0x9b   : > { %4157 = vmatmul.mubr.msk.f32.gmra.mxu0 %vm279_vm1, %v4527_v17 }
  0x9c   : > { %4107 = vmatmul.mubr.msk.f32.gmra.mxu1 %vm279_vm1, %v4680_v45  ;;  %4159 = vmatprep.mubr.msk.f32.mxu0 %vm279_vm1, %v4541_v19 }
  0x9d   : > { %4109 = vmatprep.mubr.msk.f32.mxu1 %vm279_vm1, %v4691_v46 }
  0x9f   : > { %4160 = vmatmul.mubr.msk.f32.gmra.mxu0 %vm279_vm1, %v4970_v40 }
  0xa0   : > { %4110 = vmatmul.mubr.msk.f32.gmra.mxu1 %vm279_vm1, %v3360_v4  ;;  %4162 = vmatprep.mubr.msk.f32.mxu0 %vm279_vm1, %v4558_v23 }
  0xa1   : > { %4112 = vmatprep.mubr.msk.f32.mxu1 %vm279_vm1, %v4461_v5 }
  0xa3   : > { %4163 = vmatmul.mubr.msk.f32.gmra.mxu0 %vm279_vm1, %v4564_v25 }
  0xa4   : > { %4113 = vmatmul.mubr.msk.f32.gmra.mxu1 %vm279_vm1, %v4471_v7  ;;  %4165 = vmatprep.mubr.msk.f32.mxu0 %vm279_vm1, %v4578_v27 }
  0xa5   : > { %4115 = vmatprep.mubr.msk.f32.mxu1 %vm279_vm1, %v4493_v11 }
  0xa7   : > { %4166 = vmatmul.mubr.msk.f32.gmra.mxu0 %vm279_vm1, %v4584_v29 }
  0xa8   : > { %4116 = vmatmul.mubr.msk.f32.gmra.mxu1 %vm279_vm1, %v4503_v13  ;;  %4168 = vmatprep.mubr.msk.f32.mxu0 %vm279_vm1, %v4598_v31 }
  0xa9   : > { %4118 = vmatprep.mubr.msk.f32.mxu1 %vm279_vm1, %v4521_v15 }
  0xab   : > { %4169 = vmatmul.mubr.msk.f32.gmra.mxu0 %vm279_vm1, %v4604_v33 }
  0xac   : > { %4119 = vmatmul.mubr.msk.f32.gmra.mxu1 %vm279_vm1, %v4527_v17  ;;  %4171 = vmatprep.mubr.msk.f32.mxu0 %vm279_vm1, %v4618_v35 }
  0xad   : > { %4121 = vmatprep.mubr.msk.f32.mxu1 %vm279_vm1, %v4541_v19 }
  0xaf   : > { %4172 = vmatmul.mubr.msk.f32.gmra.mxu0 %vm279_vm1, %v5004_v41 }
  0xb0   : > { %4122 = vmatmul.mubr.msk.f32.gmra.mxu1 %vm279_vm1, %v4970_v40  ;;  %4226 = vmatprep.mubr.msk.f32.mxu0 %vm279_vm1, %v4631_v38 }
  0xb1   : > { %4176 = vmatprep.mubr.msk.f32.mxu1 %vm279_vm1, %v4548_v22 }
  0xb3   : > { %4227 = vmatmul.mubr.msk.f32.vlgmr.msra.gmra.mxu0 %vm279_vm1, %v4634_v39 }
  0xb4   : > { %4177 = vmatmul.mubr.msk.f32.vlgmr.msra.gmra.mxu1 %vm279_vm1, %v4561_v24  ;;  %4325 = vmatpush3.msk.msra.mxu0 %vm376_vm0, %v4874_v47 }
  0xb5   : > { %4275 = vmatpush3.msk.msra.mxu1 %vm376_vm0, %v4869_v37  ;;  %4179 = vmatprep.mubr.msk.f32.mxu1 %vm279_vm1, %v4567_v26 }
  0xb6   : > { %4229 = vmatprep.mubr.msk.f32.mxu0 %vm279_vm1, %v4655_v42 }
  0xb7   : > { %4230 = vmatmul.mubr.msk.f32.gmra.mxu0 %vm279_vm1, %v4662_v43 }
  0xb8   : > { %4180 = vmatmul.mubr.msk.f32.gmra.mxu1 %vm279_vm1, %v4581_v28  ;;  %4232 = vmatprep.mubr.msk.f32.mxu0 %vm279_vm1, %v4677_v44 }
  0xb9   : > { %4182 = vmatprep.mubr.msk.f32.mxu1 %vm279_vm1, %v4587_v30 }
  0xbb   : > { %4233 = vmatmul.mubr.msk.f32.gmra.mxu0 %vm279_vm1, %v4680_v45 }
  0xbc   : > { %4183 = vmatmul.mubr.msk.f32.gmra.mxu1 %vm279_vm1, %v4601_v32  ;;  %4235 = vmatprep.mubr.msk.f32.mxu0 %vm279_vm1, %v4691_v46 }
  0xbd   : > { %4185 = vmatprep.mubr.msk.f32.mxu1 %vm279_vm1, %v4607_v34 }
  0xbf   : > { %4236 = vmatmul.mubr.msk.f32.gmra.mxu0 %vm279_vm1, %v3360_v4 }
  0xc0   : > { %4186 = vmatmul.mubr.msk.f32.gmra.mxu1 %vm279_vm1, %v4621_v36  ;;  %4238 = vmatprep.mubr.msk.f32.mxu0 %vm279_vm1, %v4461_v5 }
  0xc1   : > { %4188 = vmatprep.mubr.msk.f32.mxu1 %vm279_vm1, %v4800_v63 }
  0xc3   : > { %4239 = vmatmul.mubr.msk.f32.gmra.mxu0 %vm279_vm1, %v4471_v7 }
  0xc4   : > { %4189 = vmatmul.mubr.msk.f32.gmra.mxu1 %vm279_vm1, %v4811_v0  ;;  %4241 = vmatprep.mubr.msk.f32.mxu0 %vm279_vm1, %v4493_v11 }
  0xc5   : > { %4191 = vmatprep.mubr.msk.f32.mxu1 %vm279_vm1, %v4814_v1 }
  0xc7   : > { %4242 = vmatmul.mubr.msk.f32.gmra.mxu0 %vm279_vm1, %v4503_v13 }
  0xc8   : > { %4192 = vmatmul.mubr.msk.f32.gmra.mxu1 %vm279_vm1, %v4825_v2  ;;  %4244 = vmatprep.mubr.msk.f32.mxu0 %vm279_vm1, %v4521_v15 }
  0xc9   : > { %4194 = vmatprep.mubr.msk.f32.mxu1 %vm279_vm1, %v4828_v3 }
  0xcb   : > { %4245 = vmatmul.mubr.msk.f32.gmra.mxu0 %vm279_vm1, %v4527_v17 }
  0xcc   : > { %4195 = vmatmul.mubr.msk.f32.gmra.mxu1 %vm279_vm1, %v4839_v9  ;;  %4247 = vmatprep.mubr.msk.f32.mxu0 %vm279_vm1, %v4541_v19 }
  0xcd   : > { %4197 = vmatprep.mubr.msk.f32.mxu1 %vm279_vm1, %v4842_v10 }
  0xcf   : > { %4248 = vmatmul.mubr.msk.f32.gmra.mxu0 %vm279_vm1, %v4970_v40 }
  0xd0   : > { %4198 = vmatmul.mubr.msk.f32.gmra.mxu1 %vm279_vm1, %v4853_v21  ;;  %4250 = vmatprep.mubr.msk.f32.mxu0 %vm279_vm1, %v4755_v56 }
  0xd1   : > { %4200 = vmatprep.mubr.msk.f32.mxu1 %vm279_vm1, %v4558_v23 }
  0xd3   : > { %v5081_v22 = vpop.f32.mrf.mxu0  ;;  %4251 = vmatmul.mubr.msk.f32.gmra.mxu0 %vm279_vm1, %v4758_v57  ;;  %v3494_v57 = vld [vmem:[%s4452_s29 + $0x1a0] sm:$0xff] }
  0xd4   : > { %v5083_v38 = vpop.f32.mrf.mxu1  ;;  %4201 = vmatmul.mubr.msk.f32.gmra.mxu1 %vm279_vm1, %v4564_v25  ;;  %4253 = vmatprep.mubr.msk.f32.mxu0 %vm279_vm1, %v4769_v58 }
  0xd5   : > { %4203 = vmatprep.mubr.msk.f32.mxu1 %vm279_vm1, %v4578_v27  ;;  %v5093_v39 = vpop.f32.mrf.mxu0 }
  0xd6   : > { %v5095_v42 = vpop.f32.mrf.mxu1 }
  0xd7   : > { %v5097_v43 = vpop.f32.mrf.mxu0  ;;  %4254 = vmatmul.mubr.msk.f32.gmra.mxu0 %vm279_vm1, %v4772_v59 }
  0xd8   : > { %v5099_v44 = vpop.f32.mrf.mxu1  ;;  %4204 = vmatmul.mubr.msk.f32.gmra.mxu1 %vm279_vm1, %v4584_v29  ;;  %4256 = vmatprep.mubr.msk.f32.mxu0 %vm279_vm1, %v4783_v60 }
  0xd9   : > { %4206 = vmatprep.mubr.msk.f32.mxu1 %vm279_vm1, %v4598_v31  ;;  %v5109_v45 = vpop.f32.mrf.mxu0 }
  0xda   : > { %v5111_v46 = vpop.f32.mrf.mxu1 }
  0xdb   : > { %v5113_v55 = vpop.f32.mrf.mxu0  ;;  %4257 = vmatmul.mubr.msk.f32.gmra.mxu0 %vm279_vm1, %v4786_v61 }
  0xdc   : > { %v5115_v56 = vpop.f32.mrf.mxu1  ;;  %4207 = vmatmul.mubr.msk.f32.gmra.mxu1 %vm279_vm1, %v4604_v33  ;;  %4259 = vmatprep.mubr.msk.f32.mxu0 %vm279_vm1, %v4797_v62 }
  0xdd   : > { %5844 = vst [vmem:[#allocation11_spill] sm:$0xff] %v5115_v56  ;;  %4209 = vmatprep.mubr.msk.f32.mxu1 %vm279_vm1, %v4618_v35  ;;  %v5126_v58 = vpop.f32.mrf.mxu0 }
  0xde   : > { %v5128_v59 = vpop.f32.mrf.mxu1 }
  0xdf   : > { %5845 = vst [vmem:[#allocation12_spill] sm:$0xff] %v5128_v59  ;;  %v5130_v60 = vpop.f32.mrf.mxu0  ;;  %4260 = vmatmul.mubr.msk.f32.gmra.mxu0 %vm279_vm1, %v3494_v57 }
  0xe0   : > { %v5132_v63 = vpop.f32.mrf.mxu1  ;;  %4210 = vmatmul.mubr.msk.f32.gmra.mxu1 %vm279_vm1, %v5004_v41  ;;  %4262 = vmatprep.mubr.msk.f32.mxu0 %vm279_vm1, %v4468_v6 }
  0xe1   : > { %5846 = vst [vmem:[#allocation13_spill] sm:$0xff] %v5132_v63  ;;  %4212 = vmatprep.mubr.msk.f32.mxu1 %vm279_vm1, %v4702_v48  ;;  %v5141_v61 = vpop.f32.mrf.mxu0 }
  0xe2   : > { %v5143_v62 = vpop.f32.mrf.mxu1 }
  0xe3   : > { %5847 = vst [vmem:[#allocation14_spill] sm:$0xff] %v5143_v62  ;;  %v5145_v37 = vpop.f32.mrf.mxu0  ;;  %4263 = vmatmul.mubr.msk.f32.gmra.mxu0 %vm279_vm1, %v4474_v8 }
  0xe4   : > { %v5147_v47 = vpop.f32.mrf.mxu1  ;;  %4213 = vmatmul.mubr.msk.f32.gmra.mxu1 %vm279_vm1, %v4705_v49  ;;  %4265 = vmatprep.mubr.msk.f32.mxu0 %vm279_vm1, %v4496_v12 }
  0xe5   : > { %5848 = vst [vmem:[#allocation15_spill] sm:$0xff] %v5147_v47  ;;  %4215 = vmatprep.mubr.msk.f32.mxu1 %vm279_vm1, %v4716_v50  ;;  %v5157_v4 = vpop.f32.mrf.mxu0  ;;  %v5193_v47 = vld [vmem:[%s4452_s29 + $0x230] sm:$0xff] }
  0xe6   : > { %v5159_v57 = vpop.f32.mrf.mxu1  ;;  %5853 = vst [vmem:[#allocation20_spill] sm:$0xff] %v5193_v47 }
  0xe7   : > { %5849 = vst [vmem:[#allocation16_spill] sm:$0xff] %v5159_v57  ;;  %v5161_v21 = vpop.f32.mrf.mxu0  ;;  %4266 = vmatmul.mubr.msk.f32.gmra.mxu0 %vm279_vm1, %v4506_v14 }
  0xe8   : > { %v5163_v10 = vpop.f32.mrf.mxu1  ;;  %4216 = vmatmul.mubr.msk.f32.gmra.mxu1 %vm279_vm1, %v4719_v51  ;;  %4268 = vmatprep.mubr.msk.f32.mxu0 %vm279_vm1, %v4524_v16 }
  0xe9   : > { %5850 = vst [vmem:[#allocation17_spill] sm:$0xff] %v5163_v10  ;;  %4218 = vmatprep.mubr.msk.f32.mxu1 %vm279_vm1, %v4730_v52  ;;  %v5173_v9 = vpop.f32.mrf.mxu0  ;;  %v5190_v10 = vld [vmem:[%s4452_s29 + $0x111] sm:$0xff] }
  0xea   : > { %v5175_v3 = vpop.f32.mrf.mxu1 }
  0xeb   : > { %5851 = vst [vmem:[#allocation18_spill] sm:$0xff] %v5175_v3  ;;  %v5177_v57 = vpop.f32.mrf.mxu0  ;;  %4269 = vmatmul.mubr.msk.f32.gmra.mxu0 %vm279_vm1, %v4530_v18 }
  0xec   : > { %v5179_v2 = vpop.f32.mrf.mxu1  ;;  %4219 = vmatmul.mubr.msk.f32.gmra.mxu1 %vm279_vm1, %v4733_v53  ;;  %4271 = vmatprep.mubr.msk.f32.mxu0 %vm279_vm1, %v4544_v20 }
  0xed   : > { %5852 = vst [vmem:[#allocation19_spill] sm:$0xff] %v5179_v2  ;;  %4221 = vmatprep.mubr.msk.f32.mxu1 %vm279_vm1, %v4744_v54  ;;  %v5195_v3 = vpop.f32.mrf.mxu0 }
  0xee   : > { %v5197_v1 = vpop.f32.mrf.mxu1 }
  0xef   : > { %5854 = vst [vmem:[#allocation21_spill] sm:$0xff] %v5197_v1  ;;  %v5199_v2 = vpop.f32.mrf.mxu0  ;;  %4272 = vmatmul.mubr.msk.f32.gmra.mxu0 %vm279_vm1, %v5193_v47 }
  0xf0   : > { %v5201_v62 = vpop.f32.mrf.mxu1  ;;  %4222 = vmatmul.mubr.msk.f32.gmra.mxu1 %vm279_vm1, %v5190_v10  ;;  %4326 = vmatprep.mubr.msk.f32.mxu0 %vm279_vm1, %v4558_v23 }
  0xf1   : > { %5855 = vst [vmem:[#allocation22_spill] sm:$0xff] %v5201_v62  ;;  %4276 = vmatprep.mubr.msk.f32.mxu1 %vm279_vm1, %v4461_v5  ;;  %v5211_v0 = vpop.f32.mrf.mxu0 }
  0xf2   : > { %v5213_v63 = vpop.f32.mrf.mxu1 }
  0xf3   : > { %5856 = vst [vmem:[#allocation23_spill] sm:$0xff] %v5213_v63  ;;  %v4028_v59 = vpop.f32.mrf.mxu0  ;;  %4327 = vmatmul.mubr.msk.f32.vlgmr.msra.gmra.mxu0 %vm279_vm1, %v4564_v25 }
  0xf4   : > { %v3978_v1 = vpop.f32.mrf.mxu1  ;;  %4277 = vmatmul.mubr.msk.f32.vlgmr.msra.gmra.mxu1 %vm279_vm1, %v4471_v7  ;;  %4329 = vmatprep.mubr.msk.f32.mxu0 %vm279_vm1, %v4578_v27 }
  0xf5   : > { %v728_v62 = vadd.f32 %v3978_v1, %v5081_v22  ;;  %4279 = vmatprep.mubr.msk.f32.mxu1 %vm279_vm1, %v4493_v11  ;;  %v1016_v47 = vpop.f32.mrf.mxu0 }
  0xf6   : > { %v722_v5 = vpop.f32.mrf.mxu1 }
  0xf7   : > { %v5224_v36 = vadd.f32 %v4028_v59, %v728_v62  ;;  %v723_v63 = vadd.f32 %v722_v5, %v5093_v39  ;;  %v4031_v56 = vpop.f32.mrf.mxu0  ;;  %4330 = vmatmul.mubr.msk.f32.gmra.mxu0 %vm279_vm1, %v4584_v29 }
  0xf8   : > { %v3981_v20 = vpop.f32.mrf.mxu1  ;;  %4280 = vmatmul.mubr.msk.f32.gmra.mxu1 %vm279_vm1, %v4503_v13  ;;  %4332 = vmatprep.mubr.msk.f32.mxu0 %vm279_vm1, %v4598_v31 }
  0xf9   : > { %v5231_v7 = vadd.f32 %v1016_v47, %v723_v63  ;;  %v738_v11 = vadd.f32 %v3981_v20, %v5097_v43  ;;  %4282 = vmatprep.mubr.msk.f32.mxu1 %vm279_vm1, %v4521_v15  ;;  %v1026_v22 = vpop.f32.mrf.mxu0 }
  0xfa   : > { %v732_v1 = vpop.f32.mrf.mxu1 }
  0xfb   : > { %v5238_v39 = vadd.f32 %v4031_v56, %v738_v11  ;;  %v733_v59 = vadd.f32 %v732_v1, %v5109_v45  ;;  %v4034_v62 = vpop.f32.mrf.mxu0  ;;  %4333 = vmatmul.mubr.msk.f32.gmra.mxu0 %vm279_vm1, %v4604_v33 }
  0xfc   : > { %v3984_v13 = vpop.f32.mrf.mxu1  ;;  %4283 = vmatmul.mubr.msk.f32.gmra.mxu1 %vm279_vm1, %v4527_v17  ;;  %4335 = vmatprep.mubr.msk.f32.mxu0 %vm279_vm1, %v4618_v35 }
  0xfd   : > { %v5245_v20 = vadd.f32 %v1026_v22, %v733_v59  ;;  %v748_v15 = vadd.f32 %v3984_v13, %v5113_v55  ;;  %4285 = vmatprep.mubr.msk.f32.mxu1 %vm279_vm1, %v4541_v19  ;;  %v1036_v45 = vpop.f32.mrf.mxu0 }
  0xfe   : > { %v742_v43 = vpop.f32.mrf.mxu1 }
  0xff   : > { %v5252_v56 = vadd.f32 %v4034_v62, %v748_v15  ;;  %v743_v63 = vadd.f32 %v742_v43, %v5126_v58  ;;  %v4037_v47 = vpop.f32.mrf.mxu0  ;;  %4336 = vmatmul.mubr.msk.f32.gmra.mxu0 %vm279_vm1, %v5004_v41 }
 0x100   : > { %v3987_v17 = vpop.f32.mrf.mxu1  ;;  %4286 = vmatmul.mubr.msk.f32.gmra.mxu1 %vm279_vm1, %v4970_v40  ;;  %4338 = vmatprep.mubr.msk.f32.mxu0 %vm279_vm1, %v4702_v48 }
 0x101   : > { %v5259_v55 = vadd.f32 %v1036_v45, %v743_v63  ;;  %v758_v19 = vadd.f32 %v3987_v17, %v5130_v60  ;;  %4288 = vmatprep.mubr.msk.f32.mxu1 %vm279_vm1, %v4558_v23  ;;  %v1046_v58 = vpop.f32.mrf.mxu0 }
 0x102   : > { %v752_v5 = vpop.f32.mrf.mxu1 }
 0x103   : > { %v5266_v11 = vadd.f32 %v4037_v47, %v758_v19  ;;  %v753_v1 = vadd.f32 %v752_v5, %v5141_v61  ;;  %v4040_v22 = vpop.f32.mrf.mxu0  ;;  %4339 = vmatmul.mubr.msk.f32.gmra.mxu0 %vm279_vm1, %v4705_v49 }
 0x104   : > { %v3990_v40 = vpop.f32.mrf.mxu1  ;;  %4289 = vmatmul.mubr.msk.f32.gmra.mxu1 %vm279_vm1, %v4564_v25  ;;  %4341 = vmatprep.mubr.msk.f32.mxu0 %vm279_vm1, %v4716_v50 }
 0x105   : > { %v5273_v60 = vadd.f32 %v1046_v58, %v753_v1  ;;  %v768_v23 = vadd.f32 %v3990_v40, %v5145_v37  ;;  %4291 = vmatprep.mubr.msk.f32.mxu1 %vm279_vm1, %v4578_v27  ;;  %v1056_v61 = vpop.f32.mrf.mxu0 }
 0x106   : > { %v762_v48 = vpop.f32.mrf.mxu1 }
 0x107   : > { %v5280_v59 = vadd.f32 %v4040_v22, %v768_v23  ;;  %v763_v13 = vadd.f32 %v762_v48, %v5157_v4  ;;  %v4043_v62 = vpop.f32.mrf.mxu0  ;;  %4342 = vmatmul.mubr.msk.f32.gmra.mxu0 %vm279_vm1, %v4719_v51 }
 0x108   : > { %v3993_v25 = vpop.f32.mrf.mxu1  ;;  %4292 = vmatmul.mubr.msk.f32.gmra.mxu1 %vm279_vm1, %v4584_v29  ;;  %4344 = vmatprep.mubr.msk.f32.mxu0 %vm279_vm1, %v4730_v52 }
 0x109   : > { %v5287_v49 = vadd.f32 %v1056_v61, %v763_v13  ;;  %v778_v27 = vadd.f32 %v3993_v25, %v5161_v21  ;;  %4294 = vmatprep.mubr.msk.f32.mxu1 %vm279_vm1, %v4598_v31  ;;  %v1066_v37 = vpop.f32.mrf.mxu0  ;;  %v5858_v61 = vld [vmem:[#allocation2_spill] sm:$0xff]  ;;  %v5859_v13 = vld [vmem:[#allocation3_spill] sm:$0xff] }
 0x10a   : > { %v772_v50 = vpop.f32.mrf.mxu1  ;;  %v3544_v25 = vld [vmem:[%s4452_s29 + $0x1a1] sm:$0xff] }
 0x10b   : > { %v5294_v4 = vadd.f32 %v4043_v62, %v778_v27  ;;  %v773_v15 = vadd.f32 %v772_v50, %v5173_v9  ;;  %v4046_v43 = vpop.f32.mrf.mxu0  ;;  %4345 = vmatmul.mubr.msk.f32.gmra.mxu0 %vm279_vm1, %v4733_v53  ;;  %v5860_v50 = vld [vmem:[#allocation12_spill] sm:$0xff] }
 0x10c   : > { %v3996_v29 = vpop.f32.mrf.mxu1  ;;  %4295 = vmatmul.mubr.msk.f32.gmra.mxu1 %vm279_vm1, %v4604_v33  ;;  %4347 = vmatprep.mubr.msk.f32.mxu0 %vm279_vm1, %v4744_v54 }
 0x10d   : > { %v5301_v51 = vadd.f32 %v1066_v37, %v773_v15  ;;  %v788_v31 = vadd.f32 %v3996_v29, %v5177_v57  ;;  %4297 = vmatprep.mubr.msk.f32.mxu1 %vm279_vm1, %v4618_v35  ;;  %v1076_v9 = vpop.f32.mrf.mxu0  ;;  %v5861_v29 = vld [vmem:[#allocation20_spill] sm:$0xff] }
 0x10e   : > { %v782_v52 = vpop.f32.mrf.mxu1 }
 0x10f   : > { %v5308_v21 = vadd.f32 %v4046_v43, %v788_v31  ;;  %v783_v45 = vadd.f32 %v782_v52, %v5195_v3  ;;  %v4049_v63 = vpop.f32.mrf.mxu0  ;;  %4348 = vmatmul.mubr.msk.f32.gmra.mxu0 %vm279_vm1, %v5190_v10  ;;  %v5862_v31 = vld [vmem:[#allocation13_spill] sm:$0xff] }
 0x110   : > { %v3999_v33 = vpop.f32.mrf.mxu1  ;;  %4298 = vmatmul.mubr.msk.f32.gmra.mxu1 %vm279_vm1, %v5004_v41  ;;  %4350 = vmatprep.mubr.msk.f32.mxu0 %vm279_vm1, %v4561_v24 }
 0x111   : > { %v5315_v53 = vadd.f32 %v1076_v9, %v783_v45  ;;  %v798_v35 = vadd.f32 %v3999_v33, %v5199_v2  ;;  %4300 = vmatprep.mubr.msk.f32.mxu1 %vm279_vm1, %v4468_v6  ;;  %v1086_v3 = vpop.f32.mrf.mxu0  ;;  %v5863_v9 = vld [vmem:[#allocation4_spill] sm:$0xff] }
 0x112   : > { %v792_v54 = vpop.f32.mrf.mxu1 }
 0x113   : > { %v5322_v57 = vadd.f32 %v4049_v63, %v798_v35  ;;  %v793_v17 = vadd.f32 %v792_v54, %v5211_v0  ;;  %v4052_v47 = vpop.f32.mrf.mxu0  ;;  %4351 = vmatmul.mubr.msk.f32.gmra.mxu0 %vm279_vm1, %v4567_v26  ;;  %v5864_v35 = vld [vmem:[#allocation14_spill] sm:$0xff] }
 0x114   : > { %v4002_v41 = vpop.f32.mrf.mxu1  ;;  %4301 = vmatmul.mubr.msk.f32.gmra.mxu1 %vm279_vm1, %v4474_v8  ;;  %4353 = vmatprep.mubr.msk.f32.mxu0 %vm279_vm1, %v4581_v28 }
 0x115   : > { %v5329_v2 = vadd.f32 %v1086_v3, %v793_v17  ;;  %v808_v6 = vadd.f32 %v4002_v41, %v5083_v38  ;;  %4303 = vmatprep.mubr.msk.f32.mxu1 %vm279_vm1, %v4496_v12  ;;  %v1096_v0 = vpop.f32.mrf.mxu0  ;;  %v5865_v41 = vld [vmem:[#allocation5_spill] sm:$0xff] }
 0x116   : > { %v802_v10 = vpop.f32.mrf.mxu1 }
 0x117   : > { %v5336_v19 = vadd.f32 %v4052_v47, %v808_v6  ;;  %v803_v5 = vadd.f32 %v802_v10, %v5095_v42  ;;  %v4055_v58 = vpop.f32.mrf.mxu0  ;;  %4354 = vmatmul.mubr.msk.f32.gmra.mxu0 %vm279_vm1, %v4587_v30  ;;  %v5867_v10 = vld [vmem:[#allocation6_spill] sm:$0xff] }
 0x118   : > { %v4005_v8 = vpop.f32.mrf.mxu1  ;;  %4304 = vmatmul.mubr.msk.f32.gmra.mxu1 %vm279_vm1, %v4506_v14  ;;  %4356 = vmatprep.mubr.msk.f32.mxu0 %vm279_vm1, %v4601_v32 }
 0x119   : > { %v5343_v38 = vadd.f32 %v1096_v0, %v803_v5  ;;  %v818_v12 = vadd.f32 %v4005_v8, %v5099_v44  ;;  %4306 = vmatprep.mubr.msk.f32.mxu1 %vm279_vm1, %v4524_v16  ;;  %v1106_v1 = vpop.f32.mrf.mxu0  ;;  %v5857_v16 = vld [vmem:[#allocation11_spill] sm:$0xff] }
 0x11a   : > { %v812_v42 = vpop.f32.mrf.mxu1 }
 0x11b   : > { %v5350_v40 = vadd.f32 %v4055_v58, %v818_v12  ;;  %v813_v14 = vadd.f32 %v812_v42, %v5111_v46  ;;  %v4058_v23 = vpop.f32.mrf.mxu0  ;;  %4357 = vmatmul.mubr.msk.f32.gmra.mxu0 %vm279_vm1, %v4607_v34  ;;  %v5868_v58 = vld [vmem:[#allocation16_spill] sm:$0xff] }
 0x11c   : > { %v4008_v22 = vpop.f32.mrf.mxu1  ;;  %4307 = vmatmul.mubr.msk.f32.gmra.mxu1 %vm279_vm1, %v4530_v18  ;;  %4359 = vmatprep.mubr.msk.f32.mxu0 %vm279_vm1, %v5859_v13 }
 0x11d   : > { %v5357_v44 = vadd.f32 %v1106_v1, %v813_v14  ;;  %v828_v48 = vadd.f32 %v4008_v22, %v5857_v16  ;;  %4309 = vmatprep.mubr.msk.f32.mxu1 %vm279_vm1, %v5858_v61  ;;  %v1116_v62 = vpop.f32.mrf.mxu0  ;;  %v5869_v1 = vld [vmem:[#allocation7_spill] sm:$0xff] }
 0x11e   : > { %v822_v46 = vpop.f32.mrf.mxu1 }
 0x11f   : > { %v5365_v27 = vadd.f32 %v4058_v23, %v828_v48  ;;  %v823_v18 = vadd.f32 %v822_v46, %v5860_v50  ;;  %v4061_v15 = vpop.f32.mrf.mxu0  ;;  %4360 = vmatmul.mubr.msk.f32.gmra.mxu0 %vm279_vm1, %v3544_v25  ;;  %v5871_v23 = vld [vmem:[#allocation8_spill] sm:$0xff]  ;;  %v5872_v46 = vld [vmem:[#allocation18_spill] sm:$0xff] }
 0x120   : > { %v4011_v37 = vpop.f32.mrf.mxu1  ;;  %4310 = vmatmul.mubr.msk.f32.gmra.mxu1 %vm279_vm1, %v5861_v29  ;;  %4362 = vmatprep.mubr.msk.f32.mxu0 %vm279_vm1, %v5863_v9  ;;  %v5875_v29 = vld [vmem:[#allocation10_spill] sm:$0xff] }
 0x121   : > { %v5371_v43 = vadd.f32 %v1116_v62, %v823_v18  ;;  %v838_v52 = vadd.f32 %v4011_v37, %v5862_v31  ;;  %4312 = vmatprep.mubr.msk.f32.mxu1 %vm279_vm1, %v4561_v24  ;;  %v1126_v33 = vpop.f32.mrf.mxu0  ;;  %v5866_v24 = vld [vmem:[#allocation15_spill] sm:$0xff]  ;;  %v5873_v18 = vld [vmem:[#allocation9_spill] sm:$0xff] }
 0x122   : > { %v832_v45 = vpop.f32.mrf.mxu1  ;;  %v3586_v31 = vld [vmem:[%s4452_s29 + $0x231] sm:$0xff] }
 0x123   : > { %v5378_v63 = vadd.f32 %v4061_v15, %v838_v52  ;;  %v833_v54 = vadd.f32 %v832_v45, %v5864_v35  ;;  %v4064_v17 = vpop.f32.mrf.mxu0  ;;  %4363 = vmatmul.mubr.msk.f32.gmra.mxu0 %vm279_vm1, %v5865_v41 }
 0x124   : > { %v4014_v3 = vpop.f32.mrf.mxu1  ;;  %4313 = vmatmul.mubr.msk.f32.gmra.mxu1 %vm279_vm1, %v4567_v26  ;;  %4365 = vmatprep.mubr.msk.f32.mxu0 %vm279_vm1, %v5867_v10  ;;  %v5878_v10 = vld [vmem:[#allocation23_spill] sm:$0xff] }
 0x125   : > { %v5385_v47 = vadd.f32 %v1126_v33, %v833_v54  ;;  %v848_v6 = vadd.f32 %v4014_v3, %v5866_v24  ;;  %4315 = vmatprep.mubr.msk.f32.mxu1 %vm279_vm1, %v4581_v28  ;;  %v1136_v5 = vpop.f32.mrf.mxu0  ;;  %v5870_v28 = vld [vmem:[#allocation17_spill] sm:$0xff] }
 0x126   : > { %v842_v0 = vpop.f32.mrf.mxu1  ;;  %v5876_v33 = vld [vmem:[#allocation21_spill] sm:$0xff] }
 0x127   : > { %v5392_v8 = vadd.f32 %v4064_v17, %v848_v6  ;;  %v843_v12 = vadd.f32 %v842_v0, %v5868_v58  ;;  %v4067_v42 = vpop.f32.mrf.mxu0  ;;  %4366 = vmatmul.mubr.msk.f32.gmra.mxu0 %vm279_vm1, %v5869_v1  ;;  %v5877_v17 = vld [vmem:[#allocation22_spill] sm:$0xff] }
 0x128   : > { %v4017_v26 = vpop.f32.mrf.mxu1  ;;  %4316 = vmatmul.mubr.msk.f32.gmra.mxu1 %vm279_vm1, %v4587_v30  ;;  %4368 = vmatprep.mubr.msk.f32.mxu0 %vm279_vm1, %v5871_v23 }
 0x129   : > { %v5399_v14 = vadd.f32 %v1136_v5, %v843_v12  ;;  %v858_v22 = vadd.f32 %v4017_v26, %v5870_v28  ;;  %4318 = vmatprep.mubr.msk.f32.mxu1 %vm279_vm1, %v4601_v32  ;;  %v1146_v48 = vpop.f32.mrf.mxu0  ;;  %v5874_v32 = vld [vmem:[#allocation19_spill] sm:$0xff] }
 0x12a   : > { %v852_v16 = vpop.f32.mrf.mxu1 }
 0x12b   : > { %v5406_v61 = vadd.f32 %v4067_v42, %v858_v22  ;;  %v853_v30 = vadd.f32 %v852_v16, %v5872_v46  ;;  %v4070_v50 = vpop.f32.mrf.mxu0  ;;  %4369 = vmatmul.mubr.msk.f32.gmra.mxu0 %vm279_vm1, %v5873_v18 }
 0x12c   : > { %v4020_v62 = vpop.f32.mrf.mxu1  ;;  %4319 = vmatmul.mubr.msk.f32.gmra.mxu1 %vm279_vm1, %v4607_v34  ;;  %4371 = vmatprep.mubr.msk.f32.mxu0 %vm279_vm1, %v5875_v29 }
 0x12d   : > { %v5413_v37 = vadd.f32 %v1146_v48, %v853_v30  ;;  %v868_v15 = vadd.f32 %v4020_v62, %v5874_v32  ;;  %4321 = vmatprep.mubr.msk.f32.mxu1 %vm279_vm1, %v5859_v13  ;;  %v1156_v9 = vpop.f32.mrf.mxu0 }
 0x12e   : > { %v862_v52 = vpop.f32.mrf.mxu1 }
 0x12f   : > { %v5421_v45 = vadd.f32 %v4070_v50, %v868_v15  ;;  %v863_v34 = vadd.f32 %v862_v52, %v5876_v33  ;;  %v4073_v54 = vpop.f32.mrf.mxu0  ;;  %4372 = vmatmul.mubr.msk.f32.gmra.mxu0 %vm279_vm1, %v3586_v31 }
 0x130   : > { %v4023_v35 = vpop.f32.mrf.mxu1  ;;  %4322 = vmatmul.mubr.msk.f32.gmra.mxu1 %vm279_vm1, %v3544_v25 }
 0x131   : > { %v5426_v3 = vadd.f32 %v1156_v9, %v863_v34  ;;  %v878_v13 = vadd.f32 %v4023_v35, %v5877_v17  ;;  %v1166_v24 = vpop.f32.mrf.mxu0 }
 0x132   : > { %v872_v41 = vpop.f32.mrf.mxu1 }
 0x133   : > { %v5429_v6 = vadd.f32 %v4073_v54, %v878_v13  ;;  %v873_v0 = vadd.f32 %v872_v41, %v5878_v10  ;;  %v4128_v58 = vpop.f32.mrf.mxu0 }
 0x134   : > { %v4078_v5 = vpop.f32.mrf.mxu1 }
 0x135   : > { %v5432_v12 = vadd.f32 %v1166_v24, %v873_v0  ;;  %v1504_v26 = vadd.f32 %v4078_v5, %v5224_v36  ;;  %v1638_v25 = vpop.f32.mrf.mxu0 }
 0x136   : > { %v1344_v42 = vpop.f32.mrf.mxu1 }
 0x137   : > { %v5435_v1 = vadd.f32 %v4128_v58, %v1504_v26  ;;  %v1503_v28 = vadd.f32 %v1344_v42, %v5231_v7  ;;  %v4131_v23 = vpop.f32.mrf.mxu0 }
 0x138   : > { %v4081_v22 = vpop.f32.mrf.mxu1 }
 0x139   : > { %v5438_v16 = vadd.f32 %v1638_v25, %v1503_v28  ;;  %v1506_v48 = vadd.f32 %v4081_v22, %v5238_v39  ;;  %v1648_v30 = vpop.f32.mrf.mxu0 }
 0x13a   : > { %v1354_v46 = vpop.f32.mrf.mxu1 }
 0x13b   : > { %v5441_v62 = vadd.f32 %v4131_v23, %v1506_v48  ;;  %v1505_v50 = vadd.f32 %v1354_v46, %v5245_v20  ;;  %v4134_v36 = vpop.f32.mrf.mxu0 }
 0x13c   : > { %v4084_v18 = vpop.f32.mrf.mxu1 }
 0x13d   : > { %v5444_v32 = vadd.f32 %v1648_v30, %v1505_v50  ;;  %v1508_v15 = vadd.f32 %v4084_v18, %v5252_v56  ;;  %v1658_v7 = vpop.f32.mrf.mxu0 }
 0x13e   : > { %v1364_v29 = vpop.f32.mrf.mxu1 }
 0x13f   : > { %v5447_v31 = vadd.f32 %v4134_v36, %v1508_v15  ;;  %v1507_v52 = vadd.f32 %v1364_v29, %v5259_v55  ;;  %v4137_v39 = vpop.f32.mrf.mxu0 }
 0x140   : > { %v4087_v9 = vpop.f32.mrf.mxu1 }
 0x141   : > { %v5450_v33 = vadd.f32 %v1658_v7, %v1507_v52  ;;  %v1510_v34 = vadd.f32 %v4087_v9, %v5266_v11  ;;  %v1668_v20 = vpop.f32.mrf.mxu0 }
 0x142   : > { %v1374_v35 = vpop.f32.mrf.mxu1 }
 0x143   : > { %v5453_v54 = vadd.f32 %v4137_v39, %v1510_v34  ;;  %v1509_v17 = vadd.f32 %v1374_v35, %v5273_v60  ;;  %v4140_v56 = vpop.f32.mrf.mxu0 }
 0x144   : > { %v4090_v13 = vpop.f32.mrf.mxu1 }
 0x145   : > { %v5456_v41 = vadd.f32 %v1668_v20, %v1509_v17  ;;  %v1512_v24 = vadd.f32 %v4090_v13, %v5280_v59  ;;  %v1678_v55 = vpop.f32.mrf.mxu0 }
 0x146   : > { %v1384_v10 = vpop.f32.mrf.mxu1 }
 0x147   : > { %v5459_v0 = vadd.f32 %v4140_v56, %v1512_v24  ;;  %v1511_v5 = vadd.f32 %v1384_v10, %v5287_v49  ;;  %v4143_v11 = vpop.f32.mrf.mxu0 }
 0x148   : > { %v4093_v58 = vpop.f32.mrf.mxu1 }
 0x149   : > { %v5462_v26 = vadd.f32 %v1678_v55, %v1511_v5  ;;  %v1514_v42 = vadd.f32 %v4093_v58, %v5294_v4  ;;  %v1688_v60 = vpop.f32.mrf.mxu0 }
 0x14a   : > { %v1394_v25 = vpop.f32.mrf.mxu1 }
 0x14b   : > { %v5465_v28 = vadd.f32 %v4143_v11, %v1514_v42  ;;  %v1513_v22 = vadd.f32 %v1394_v25, %v5301_v51  ;;  %v4146_v59 = vpop.f32.mrf.mxu0 }
 0x14c   : > { %v4096_v23 = vpop.f32.mrf.mxu1 }
 0x14d   : > { %v5468_v48 = vadd.f32 %v1688_v60, %v1513_v22  ;;  %v1516_v46 = vadd.f32 %v4096_v23, %v5308_v21  ;;  %v1698_v49 = vpop.f32.mrf.mxu0 }
 0x14e   : > { %v1404_v30 = vpop.f32.mrf.mxu1 }
 0x14f   : > { %v5471_v50 = vadd.f32 %v4146_v59, %v1516_v46  ;;  %v1515_v18 = vadd.f32 %v1404_v30, %v5315_v53  ;;  %v4149_v4 = vpop.f32.mrf.mxu0 }
 0x150   : > { %v4099_v36 = vpop.f32.mrf.mxu1 }
 0x151   : > { %v5474_v15 = vadd.f32 %v1698_v49, %v1515_v18  ;;  %v1518_v29 = vadd.f32 %v4099_v36, %v5322_v57  ;;  %v1708_v51 = vpop.f32.mrf.mxu0 }
 0x152   : > { %v1414_v7 = vpop.f32.mrf.mxu1 }
 0x153   : > { %v5477_v52 = vadd.f32 %v4149_v4, %v1518_v29  ;;  %v1517_v9 = vadd.f32 %v1414_v7, %v5329_v2  ;;  %v4152_v21 = vpop.f32.mrf.mxu0 }
 0x154   : > { %v4102_v39 = vpop.f32.mrf.mxu1 }
 0x155   : > { %v5480_v34 = vadd.f32 %v1708_v51, %v1517_v9  ;;  %v1520_v35 = vadd.f32 %v4102_v39, %v5336_v19  ;;  %v1718_v53 = vpop.f32.mrf.mxu0 }
 0x156   : > { %v1424_v20 = vpop.f32.mrf.mxu1 }
 0x157   : > { %v5483_v17 = vadd.f32 %v4152_v21, %v1520_v35  ;;  %v1519_v13 = vadd.f32 %v1424_v20, %v5343_v38  ;;  %v4155_v57 = vpop.f32.mrf.mxu0 }
 0x158   : > { %v4105_v56 = vpop.f32.mrf.mxu1 }
 0x159   : > { %v5486_v24 = vadd.f32 %v1718_v53, %v1519_v13  ;;  %v1522_v10 = vadd.f32 %v4105_v56, %v5350_v40  ;;  %v1728_v2 = vpop.f32.mrf.mxu0 }
 0x15a   : > { %v1434_v55 = vpop.f32.mrf.mxu1 }
 0x15b   : > { %v5489_v5 = vadd.f32 %v4155_v57, %v1522_v10  ;;  %v1521_v58 = vadd.f32 %v1434_v55, %v5357_v44  ;;  %v4158_v19 = vpop.f32.mrf.mxu0 }
 0x15c   : > { %v4108_v11 = vpop.f32.mrf.mxu1 }
 0x15d   : > { %v5492_v42 = vadd.f32 %v1728_v2, %v1521_v58  ;;  %v1524_v25 = vadd.f32 %v4108_v11, %v5365_v27  ;;  %v1738_v38 = vpop.f32.mrf.mxu0 }
 0x15e   : > { %v1444_v60 = vpop.f32.mrf.mxu1 }
 0x15f   : > { %v5495_v22 = vadd.f32 %v4158_v19, %v1524_v25  ;;  %v1523_v23 = vadd.f32 %v1444_v60, %v5371_v43  ;;  %v4161_v40 = vpop.f32.mrf.mxu0 }
 0x160   : > { %v4111_v59 = vpop.f32.mrf.mxu1 }
 0x161   : > { %v5498_v46 = vadd.f32 %v1738_v38, %v1523_v23  ;;  %v1526_v30 = vadd.f32 %v4111_v59, %v5378_v63  ;;  %v1748_v44 = vpop.f32.mrf.mxu0 }
 0x162   : > { %v1454_v49 = vpop.f32.mrf.mxu1 }
 0x163   : > { %v5501_v18 = vadd.f32 %v4161_v40, %v1526_v30  ;;  %v1525_v36 = vadd.f32 %v1454_v49, %v5385_v47  ;;  %v4164_v27 = vpop.f32.mrf.mxu0 }
 0x164   : > { %v4114_v4 = vpop.f32.mrf.mxu1 }
 0x165   : > { %v5504_v29 = vadd.f32 %v1748_v44, %v1525_v36  ;;  %v1528_v7 = vadd.f32 %v4114_v4, %v5392_v8  ;;  %v1758_v43 = vpop.f32.mrf.mxu0 }
 0x166   : > { %v1464_v51 = vpop.f32.mrf.mxu1 }
 0x167   : > { %v5507_v9 = vadd.f32 %v4164_v27, %v1528_v7  ;;  %v1527_v39 = vadd.f32 %v1464_v51, %v5399_v14  ;;  %v4167_v63 = vpop.f32.mrf.mxu0 }
 0x168   : > { %v4117_v21 = vpop.f32.mrf.mxu1 }
 0x169   : > { %v5510_v35 = vadd.f32 %v1758_v43, %v1527_v39  ;;  %v1530_v20 = vadd.f32 %v4117_v21, %v5406_v61  ;;  %v1768_v47 = vpop.f32.mrf.mxu0 }
 0x16a   : > { %v1474_v53 = vpop.f32.mrf.mxu1 }
 0x16b   : > { %v5513_v13 = vadd.f32 %v4167_v63, %v1530_v20  ;;  %v1529_v56 = vadd.f32 %v1474_v53, %v5413_v37  ;;  %v4170_v8 = vpop.f32.mrf.mxu0 }
 0x16c   : > { %v4120_v57 = vpop.f32.mrf.mxu1 }
 0x16d   : > { %v5516_v10 = vadd.f32 %v1768_v47, %v1529_v56  ;;  %v1532_v55 = vadd.f32 %v4120_v57, %v5421_v45  ;;  %v1778_v14 = vpop.f32.mrf.mxu0 }
 0x16e   : > { %v1484_v2 = vpop.f32.mrf.mxu1 }
 0x16f   : > { %v5519_v58 = vadd.f32 %v4170_v8, %v1532_v55  ;;  %v1531_v11 = vadd.f32 %v1484_v2, %v5426_v3  ;;  %v4173_v61 = vpop.f32.mrf.mxu0 }
 0x170   : > { %v4123_v19 = vpop.f32.mrf.mxu1 }
 0x171   : > { %v5522_v25 = vadd.f32 %v1778_v14, %v1531_v11  ;;  %v1534_v60 = vadd.f32 %v4123_v19, %v5429_v6  ;;  %v1788_v37 = vpop.f32.mrf.mxu0 }
 0x172   : > { %v1494_v38 = vpop.f32.mrf.mxu1 }
 0x173   : > { %v5525_v23 = vadd.f32 %v4173_v61, %v1534_v60  ;;  %v1533_v59 = vadd.f32 %v1494_v38, %v5432_v12  ;;  %v4228_v45 = vpop.f32.mrf.mxu0 }
 0x174   : > { %v4178_v40 = vpop.f32.mrf.mxu1 }
 0x175   : > { %5879 = vst [vmem:[#allocation11_spill] sm:$0xff] %v5525_v23  ;;  %v5528_v30 = vadd.f32 %v1788_v37, %v1533_v59  ;;  %v2092_v49 = vadd.f32 %v4178_v40, %v5435_v1  ;;  %v2260_v3 = vpop.f32.mrf.mxu0 }
 0x176   : > { %v1932_v44 = vpop.f32.mrf.mxu1 }
 0x177   : > { %v5531_v36 = vadd.f32 %v4228_v45, %v2092_v49  ;;  %v2091_v4 = vadd.f32 %v1932_v44, %v5438_v16  ;;  %v4231_v6 = vpop.f32.mrf.mxu0 }
 0x178   : > { %v4181_v27 = vpop.f32.mrf.mxu1 }
 0x179   : > { %v5534_v7 = vadd.f32 %v2260_v3, %v2091_v4  ;;  %v2094_v51 = vadd.f32 %v4181_v27, %v5441_v62  ;;  %v2270_v12 = vpop.f32.mrf.mxu0 }
 0x17a   : > { %v1942_v43 = vpop.f32.mrf.mxu1 }
 0x17b   : > { %v5537_v39 = vadd.f32 %v4231_v6, %v2094_v51  ;;  %v2093_v21 = vadd.f32 %v1942_v43, %v5444_v32  ;;  %v4234_v1 = vpop.f32.mrf.mxu0 }
 0x17c   : > { %v4184_v63 = vpop.f32.mrf.mxu1 }
 0x17d   : > { %v5540_v20 = vadd.f32 %v2270_v12, %v2093_v21  ;;  %v2096_v53 = vadd.f32 %v4184_v63, %v5447_v31  ;;  %v2280_v16 = vpop.f32.mrf.mxu0 }
 0x17e   : > { %v1952_v47 = vpop.f32.mrf.mxu1 }
 0x17f   : > { %v5543_v56 = vadd.f32 %v4234_v1, %v2096_v53  ;;  %v2095_v57 = vadd.f32 %v1952_v47, %v5450_v33  ;;  %v4237_v62 = vpop.f32.mrf.mxu0 }
 0x180   : > { %v4187_v8 = vpop.f32.mrf.mxu1 }
 0x181   : > { %v5546_v55 = vadd.f32 %v2280_v16, %v2095_v57  ;;  %v2098_v2 = vadd.f32 %v4187_v8, %v5453_v54  ;;  %v2290_v32 = vpop.f32.mrf.mxu0 }
 0x182   : > { %v1962_v14 = vpop.f32.mrf.mxu1 }
 0x183   : > { %v5549_v11 = vadd.f32 %v4237_v62, %v2098_v2  ;;  %v2097_v19 = vadd.f32 %v1962_v14, %v5456_v41  ;;  %v4240_v31 = vpop.f32.mrf.mxu0 }
 0x184   : > { %v4190_v61 = vpop.f32.mrf.mxu1 }
 0x185   : > { %v5552_v60 = vadd.f32 %v2290_v32, %v2097_v19  ;;  %v2100_v38 = vadd.f32 %v4190_v61, %v5459_v0  ;;  %v2300_v33 = vpop.f32.mrf.mxu0 }
 0x186   : > { %v1972_v37 = vpop.f32.mrf.mxu1 }
 0x187   : > { %v5555_v59 = vadd.f32 %v4240_v31, %v2100_v38  ;;  %v2099_v40 = vadd.f32 %v1972_v37, %v5462_v26  ;;  %v4243_v54 = vpop.f32.mrf.mxu0 }
 0x188   : > { %v4193_v45 = vpop.f32.mrf.mxu1 }
 0x189   : > { %v5558_v49 = vadd.f32 %v2300_v33, %v2099_v40  ;;  %v2102_v44 = vadd.f32 %v4193_v45, %v5465_v28  ;;  %v2310_v41 = vpop.f32.mrf.mxu0 }
 0x18a   : > { %v1982_v3 = vpop.f32.mrf.mxu1 }
 0x18b   : > { %v5561_v4 = vadd.f32 %v4243_v54, %v2102_v44  ;;  %v2101_v27 = vadd.f32 %v1982_v3, %v5468_v48  ;;  %v4246_v0 = vpop.f32.mrf.mxu0 }
 0x18c   : > { %v4196_v6 = vpop.f32.mrf.mxu1 }
 0x18d   : > { %v5564_v51 = vadd.f32 %v2310_v41, %v2101_v27  ;;  %v2104_v43 = vadd.f32 %v4196_v6, %v5471_v50  ;;  %v2320_v26 = vpop.f32.mrf.mxu0 }
 0x18e   : > { %v1992_v12 = vpop.f32.mrf.mxu1 }
 0x18f   : > { %v5567_v21 = vadd.f32 %v4246_v0, %v2104_v43  ;;  %v2103_v63 = vadd.f32 %v1992_v12, %v5474_v15  ;;  %v4249_v28 = vpop.f32.mrf.mxu0 }
 0x190   : > { %v4199_v1 = vpop.f32.mrf.mxu1 }
 0x191   : > { %v5570_v53 = vadd.f32 %v2320_v26, %v2103_v63  ;;  %v2106_v47 = vadd.f32 %v4199_v1, %v5477_v52  ;;  %v2330_v48 = vpop.f32.mrf.mxu0 }
 0x192   : > { %v2002_v16 = vpop.f32.mrf.mxu1 }
 0x193   : > { %v5573_v57 = vadd.f32 %v4249_v28, %v2106_v47  ;;  %v2105_v8 = vadd.f32 %v2002_v16, %v5480_v34  ;;  %v4252_v50 = vpop.f32.mrf.mxu0 }
 0x194   : > { %v4202_v62 = vpop.f32.mrf.mxu1 }
 0x195   : > { %v5576_v2 = vadd.f32 %v2330_v48, %v2105_v8  ;;  %v2108_v14 = vadd.f32 %v4202_v62, %v5483_v17  ;;  %v2340_v15 = vpop.f32.mrf.mxu0 }
 0x196   : > { %v2012_v32 = vpop.f32.mrf.mxu1 }
 0x197   : > { %v5579_v19 = vadd.f32 %v4252_v50, %v2108_v14  ;;  %v2107_v61 = vadd.f32 %v2012_v32, %v5486_v24  ;;  %v4255_v52 = vpop.f32.mrf.mxu0 }
 0x198   : > { %v4205_v31 = vpop.f32.mrf.mxu1 }
 0x199   : > { %v5582_v38 = vadd.f32 %v2340_v15, %v2107_v61  ;;  %v2110_v37 = vadd.f32 %v4205_v31, %v5489_v5  ;;  %v2350_v34 = vpop.f32.mrf.mxu0 }
 0x19a   : > { %v2022_v33 = vpop.f32.mrf.mxu1 }
 0x19b   : > { %v5585_v40 = vadd.f32 %v4255_v52, %v2110_v37  ;;  %v2109_v45 = vadd.f32 %v2022_v33, %v5492_v42  ;;  %v4258_v17 = vpop.f32.mrf.mxu0 }
 0x19c   : > { %v4208_v54 = vpop.f32.mrf.mxu1 }
 0x19d   : > { %v5588_v44 = vadd.f32 %v2350_v34, %v2109_v45  ;;  %v2112_v3 = vadd.f32 %v4208_v54, %v5495_v22  ;;  %v2360_v24 = vpop.f32.mrf.mxu0 }
 0x19e   : > { %v2032_v41 = vpop.f32.mrf.mxu1 }
 0x19f   : > { %5880 = vst [vmem:[#allocation2_spill] sm:$0xff] %v5588_v44  ;;  %v5591_v27 = vadd.f32 %v4258_v17, %v2112_v3  ;;  %v2111_v6 = vadd.f32 %v2032_v41, %v5498_v46  ;;  %v4261_v5 = vpop.f32.mrf.mxu0 }
 0x1a0   : > { %v4211_v0 = vpop.f32.mrf.mxu1 }
 0x1a1   : > { %5881 = vst [vmem:[#allocation3_spill] sm:$0xff] %v5591_v27  ;;  %v5594_v43 = vadd.f32 %v2360_v24, %v2111_v6  ;;  %v2114_v12 = vadd.f32 %v4211_v0, %v5501_v18  ;;  %v2370_v42 = vpop.f32.mrf.mxu0 }
 0x1a2   : > { %v2042_v26 = vpop.f32.mrf.mxu1 }
 0x1a3   : > { %5882 = vst [vmem:[#allocation12_spill] sm:$0xff] %v5594_v43  ;;  %v5597_v63 = vadd.f32 %v4261_v5, %v2114_v12  ;;  %v2113_v1 = vadd.f32 %v2042_v26, %v5504_v29  ;;  %v5602_v22 = vpop.f32.mrf.mxu0 }
 0x1a4   : > { %v5600_v28 = vpop.f32.mrf.mxu1 }
 0x1a5   : > { %5883 = vst [vmem:[#allocation20_spill] sm:$0xff] %v5597_v63  ;;  %v5604_v47 = vadd.f32 %v2370_v42, %v2113_v1  ;;  %v5608_v46 = vpop.f32.mrf.mxu0 }
 0x1a6   : > { %v5606_v16 = vpop.f32.mrf.mxu1 }
 0x1a7   : > { %5884 = vst [vmem:[#allocation13_spill] sm:$0xff] %v5604_v47  ;;  %v5612_v8 = vpop.f32.mrf.mxu0 }
 0x1a8   : > { %v5610_v48 = vpop.f32.mrf.mxu1 }
 0x1a9   : > { %v5616_v62 = vpop.f32.mrf.mxu0 }
 0x1aa   : > { %v5614_v18 = vpop.f32.mrf.mxu1 }
 0x1ab   : > { %v5620_v29 = vpop.f32.mrf.mxu0 }
 0x1ac   : > { %v5618_v50 = vpop.f32.mrf.mxu1  ;;  %5885 = vst [vmem:[#allocation4_spill] sm:$0xff] %v5620_v29 }
 0x1ad   : > { %v5624_v32 = vpop.f32.mrf.mxu0 }
 0x1ae   : > { %v5622_v14 = vpop.f32.mrf.mxu1  ;;  %5886 = vst [vmem:[#allocation14_spill] sm:$0xff] %v5624_v32 }
 0x1af   : > { %v5628_v61 = vpop.f32.mrf.mxu0 }
 0x1b0   : > { %v5626_v15 = vpop.f32.mrf.mxu1  ;;  %5888 = vst [vmem:[#allocation15_spill] sm:$0xff] %v5628_v61 }
 0x1b1   : > { %5887 = vst [vmem:[#allocation5_spill] sm:$0xff] %v5626_v15  ;;  %v2410_v52 = vpop.f32.mrf.mxu0 }
 0x1b2   : > { %v2082_v31 = vpop.f32.mrf.mxu1 }
 0x1b3   : > { %v2121_v37 = vadd.f32 %v2082_v31, %v5528_v30  ;;  %v4328_v34 = vpop.f32.mrf.mxu0 }
 0x1b4   : > { %v4278_v33 = vpop.f32.mrf.mxu1 }
 0x1b5   : > { %v5631_v45 = vadd.f32 %v2410_v52, %v2121_v37  ;;  %v2848_v17 = vpop.f32.mrf.mxu0  ;;  %v2714_v30 = vadd.f32 %v4278_v33, %v5531_v36 }
 0x1b6   : > { %v2554_v54 = vpop.f32.mrf.mxu1 }
 0x1b7   : > { %5889 = vst [vmem:[#allocation6_spill] sm:$0xff] %v5631_v45  ;;  %v4331_v41 = vpop.f32.mrf.mxu0  ;;  %v2713_v31 = vadd.f32 %v2554_v54, %v5534_v7  ;;  %v5636_v63 = vadd.f32 %v4328_v34, %v2714_v30 }
 0x1b8   : > { %v4281_v3 = vpop.f32.mrf.mxu1 }
 0x1b9   : > { %v2858_v6 = vpop.f32.mrf.mxu0  ;;  %v2716_v43 = vadd.f32 %v4281_v3, %v5537_v39  ;;  %v5642_v15 = vadd.f32 %v2848_v17, %v2713_v31 }
 0x1ba   : > { %v2564_v24 = vpop.f32.mrf.mxu1 }
 0x1bb   : > { %v4334_v5 = vpop.f32.mrf.mxu0  ;;  %v2715_v7 = vadd.f32 %v2564_v24, %v5540_v20  ;;  %v5651_v3 = vadd.f32 %v4331_v41, %v2716_v43 }
 0x1bc   : > { %v4284_v0 = vpop.f32.mrf.mxu1 }
 0x1bd   : > { %v2868_v26 = vpop.f32.mrf.mxu0  ;;  %v2718_v54 = vadd.f32 %v4284_v0, %v5543_v56 }
 0x1be   : > { %v2574_v12 = vpop.f32.mrf.mxu1 }
 0x1bf   : > { %v4337_v1 = vpop.f32.mrf.mxu0  ;;  %v2717_v17 = vadd.f32 %v2574_v12, %v5546_v55  ;;  %v5666_v43 = vadd.f32 %v4334_v5, %v2718_v54 }
 0x1c0   : > { %v4287_v42 = vpop.f32.mrf.mxu1 }
 0x1c1   : > { %v2878_v61 = vpop.f32.mrf.mxu0  ;;  %v2720_v30 = vadd.f32 %v4287_v42, %v5549_v11  ;;  %v5674_v12 = vadd.f32 %v2868_v26, %v2717_v17 }
 0x1c2   : > { %v2584_v47 = vpop.f32.mrf.mxu1 }
 0x1c3   : > { %v4340_v37 = vpop.f32.mrf.mxu0 }
 0x1c4   : > { %v4290_v52 = vpop.f32.mrf.mxu1 }
 0x1c5   : > { %v2722_v45 = vadd.f32 %v4290_v52, %v5555_v59  ;;  %v2888_v29 = vpop.f32.mrf.mxu0 }
 0x1c6   : > { %v2594_v32 = vpop.f32.mrf.mxu1 }
 0x1c7   : > { %v5639_v27 = vadd.f32 %v4340_v37, %v2722_v45  ;;  %v2721_v44 = vadd.f32 %v2594_v32, %v5558_v49  ;;  %v4343_v36 = vpop.f32.mrf.mxu0  ;;  %v2719_v37 = vadd.f32 %v2584_v47, %v5552_v60 }
 0x1c8   : > { %v4293_v23 = vpop.f32.mrf.mxu1 }
 0x1c9   : > { %v3040_v33 = vmax.f32 %v5636_v63, %v5639_v27  ;;  %v5647_v59 = vadd.f32 %v2888_v29, %v2721_v44  ;;  %v2724_v34 = vadd.f32 %v4293_v23, %v5561_v4  ;;  %v2898_v45 = vpop.f32.mrf.mxu0  ;;  %v5659_v29 = vadd.f32 %v2858_v6, %v2715_v7 }
 0x1ca   : > { %v2604_v39 = vpop.f32.mrf.mxu1  ;;  %v5682_v7 = vadd.f32 %v4337_v1, %v2720_v30  ;;  %v5689_v47 = vadd.f32 %v2878_v61, %v2719_v37  ;;  %v2116_v61 = vadd.f32 %v5600_v28, %v5507_v9  ;;  %v2118_v37 = vadd.f32 %v5610_v48, %v5513_v13 }
 0x1cb   : > { %v3039_v49 = vmax.f32 %v5642_v15, %v5647_v59  ;;  %v5655_v32 = vadd.f32 %v4343_v36, %v2724_v34  ;;  %v2723_v20 = vadd.f32 %v2604_v39, %v5564_v51  ;;  %v4346_v44 = vpop.f32.mrf.mxu0  ;;  %v5899_v59 = vld [vmem:[#allocation13_spill] sm:$0xff] }
 0x1cc   : > { %v4296_v24 = vpop.f32.mrf.mxu1 }
 0x1cd   : > { %v3042_v23 = vmax.f32 %v5651_v3, %v5655_v32  ;;  %v5663_v56 = vadd.f32 %v2898_v45, %v2723_v20  ;;  %v2726_v4 = vadd.f32 %v4296_v24, %v5567_v21  ;;  %v2908_v0 = vpop.f32.mrf.mxu0 }
 0x1ce   : > { %v2614_v41 = vpop.f32.mrf.mxu1 }
 0x1cf   : > { %v5671_v51 = vadd.f32 %v4346_v44, %v2726_v4  ;;  %v2725_v6 = vadd.f32 %v2614_v41, %v5570_v53  ;;  %v4349_v52 = vpop.f32.mrf.mxu0  ;;  %v5900_v32 = vmax.f32 %v5659_v29, %v5663_v56 }
 0x1d0   : > { %v4299_v31 = vpop.f32.mrf.mxu1 }
 0x1d1   : > { %v5679_v5 = vadd.f32 %v2908_v0, %v2725_v6  ;;  %v2728_v11 = vadd.f32 %v4299_v31, %v5573_v57  ;;  %v2918_v36 = vpop.f32.mrf.mxu0  ;;  %v5901_v56 = vmax.f32 %v5666_v43, %v5671_v51 }
 0x1d2   : > { %v2624_v42 = vpop.f32.mrf.mxu1 }
 0x1d3   : > { %v5686_v26 = vadd.f32 %v4349_v52, %v2728_v11  ;;  %v2727_v34 = vadd.f32 %v2624_v42, %v5576_v2  ;;  %v4352_v60 = vpop.f32.mrf.mxu0  ;;  %v2115_v52 = vadd.f32 %v5606_v16, %v5510_v35  ;;  %v2446_v16 = vadd.f32 %v5612_v8, %v2118_v37 }
 0x1d4   : > { %v4302_v54 = vpop.f32.mrf.mxu1  ;;  %v5903_v43 = vmax.f32 %v5674_v12, %v5679_v5 }
 0x1d5   : > { %v5693_v45 = vadd.f32 %v2918_v36, %v2727_v34  ;;  %v2928_v20 = vpop.f32.mrf.mxu0  ;;  %v2444_v36 = vadd.f32 %v5602_v22, %v2116_v61  ;;  %v2117_v34 = vadd.f32 %v5614_v18, %v5516_v10  ;;  %v2730_v1 = vadd.f32 %v4302_v54, %v5579_v19  ;;  %v5890_v18 = vld [vmem:[#allocation11_spill] sm:$0xff] }
 0x1d6   : > { %v2634_v57 = vpop.f32.mrf.mxu1  ;;  %v2443_v28 = vadd.f32 %v5608_v46, %v2115_v52  ;;  %v2120_v19 = vadd.f32 %v5618_v50, %v5519_v58  ;;  %v2119_v46 = vadd.f32 %v5622_v14, %v5522_v25  ;;  %v5895_v58 = vld [vmem:[#allocation20_spill] sm:$0xff]  ;;  %v5727_v25 = vld [vmem:[%s5820_s2] ss:$0 sm:$0xff]  ;;  %v5904_v12 = vmax.f32 %v5682_v7, %v5686_v26 }
 0x1d7   : > { %v4355_v24 = vpop.f32.mrf.mxu0  ;;  %v2729_v53 = vadd.f32 %v2634_v57, %v5582_v38  ;;  %v2445_v22 = vadd.f32 %v5616_v62, %v2117_v34  ;;  %v3024_v61 = vadd.f32 %v4352_v60, %v2730_v1  ;;  %v5891_v38 = vld [vmem:[#allocation5_spill] sm:$0xff]  ;;  %v5893_v1 = vld [vmem:[#allocation3_spill] sm:$0xff]  ;;  %v5894_v34 = vld [vmem:[#allocation12_spill] sm:$0xff] }
 0x1d8   : > { %v4305_v17 = vpop.f32.mrf.mxu1  ;;  %v2122_v54 = vadd.f32 %v5891_v38, %v5890_v18 }
 0x1d9   : > { %v2938_v4 = vpop.f32.mrf.mxu0  ;;  %v2732_v13 = vadd.f32 %v4305_v17, %v5585_v40  ;;  %v3023_v17 = vadd.f32 %v2928_v20, %v2729_v53 }
 0x1da   : > { %v2644_v44 = vpop.f32.mrf.mxu1 }
 0x1db   : > { %v4358_v2 = vpop.f32.mrf.mxu0  ;;  %v3026_v60 = vadd.f32 %v4355_v24, %v2732_v13  ;;  %v5896_v24 = vld [vmem:[#allocation4_spill] sm:$0xff] }
 0x1dc   : > { %v4308_v41 = vpop.f32.mrf.mxu1 }
 0x1dd   : > { %v2948_v30 = vpop.f32.mrf.mxu0 }
 0x1de   : > { %v2654_v0 = vpop.f32.mrf.mxu1 }
 0x1df   : > { %v4361_v31 = vpop.f32.mrf.mxu0 }
 0x1e0   : > { %v4311_v6 = vpop.f32.mrf.mxu1 }
 0x1e1   : > { %v5703_v42 = vpop.f32.mrf.mxu0  ;;  %v2736_v50 = vadd.f32 %v4311_v6, %v5895_v58  ;;  %v5898_v6 = vld [vmem:[#allocation15_spill] sm:$0xff] }
 0x1e2   : > { %v2664_v11 = vpop.f32.mrf.mxu1 }
 0x1e3   : > { %v4364_v9 = vpop.f32.mrf.mxu0  ;;  %v3030_v18 = vadd.f32 %v4361_v31, %v2736_v50 }
 0x1e4   : > { %v4314_v39 = vpop.f32.mrf.mxu1 }
 0x1e5   : > { %v2738_v35 = vadd.f32 %v4314_v39, %v2444_v36  ;;  %v2968_v21 = vpop.f32.mrf.mxu0  ;;  %v5892_v39 = vld [vmem:[#allocation2_spill] sm:$0xff]  ;;  %v2734_v36 = vadd.f32 %v4308_v41, %v5893_v1  ;;  %v2448_v41 = vadd.f32 %v5896_v24, %v2120_v19 }
 0x1e6   : > { %v2674_v48 = vpop.f32.mrf.mxu1  ;;  %v2731_v8 = vadd.f32 %v2644_v44, %v5892_v39 }
 0x1e7   : > { %v3032_v55 = vadd.f32 %v4364_v9, %v2738_v35  ;;  %v2737_v10 = vadd.f32 %v2674_v48, %v2443_v28  ;;  %v4367_v40 = vpop.f32.mrf.mxu0  ;;  %v2733_v9 = vadd.f32 %v2654_v0, %v5894_v34  ;;  %v5897_v0 = vld [vmem:[#allocation14_spill] sm:$0xff]  ;;  %v2450_v35 = vadd.f32 %v5898_v6, %v2122_v54 }
 0x1e8   : > { %v4317_v57 = vpop.f32.mrf.mxu1  ;;  %v2447_v28 = vadd.f32 %v5897_v0, %v2119_v46 }
 0x1e9   : > { %v3048_v52 = vmax.f32 %v3024_v61, %v3032_v55  ;;  %v3031_v37 = vadd.f32 %v2968_v21, %v2737_v10  ;;  %v2740_v62 = vadd.f32 %v4317_v57, %v2446_v16  ;;  %v2978_v44 = vpop.f32.mrf.mxu0  ;;  %v3025_v16 = vadd.f32 %v2938_v4, %v2731_v8  ;;  %v5742_v4 = vld [vmem:[%s5821_s3] ss:$0 sm:$0xff] }
 0x1ea   : > { %v2684_v14 = vpop.f32.mrf.mxu1  ;;  %v3028_v10 = vadd.f32 %v4358_v2, %v2734_v36 }
 0x1eb   : > { %v3056_v55 = vmax.f32 %v3040_v33, %v3048_v52  ;;  %v3047_v21 = vmax.f32 %v3023_v17, %v3031_v37  ;;  %v3034_v53 = vadd.f32 %v4367_v40, %v2740_v62  ;;  %v2739_v20 = vadd.f32 %v2684_v14, %v2445_v22  ;;  %v4370_v48 = vpop.f32.mrf.mxu0  ;;  %v5753_v40 = vld [vmem:[%s5822_s4] ss:$0 sm:$0xff] }
 0x1ec   : > { %v4320_v13 = vpop.f32.mrf.mxu1  ;;  %v3027_v22 = vadd.f32 %v2948_v30, %v2733_v9 }
 0x1ed   : > { %v3071_v61 = vadd.f32 %v5727_v25, %v3056_v55  ;;  %v3055_v27 = vmax.f32 %v3039_v49, %v3047_v21  ;;  %v3050_v63 = vmax.f32 %v3026_v60, %v3034_v53  ;;  %v3033_v33 = vadd.f32 %v2978_v44, %v2739_v20  ;;  %v2988_v46 = vpop.f32.mrf.mxu0  ;;  %v5902_v21 = vld [vmem:[#allocation6_spill] sm:$0xff] }
 0x1ee   : > { %v2742_v19 = vadd.f32 %v4320_v13, %v2448_v41  ;;  %v2694_v38 = vpop.f32.mrf.mxu1  ;;  %v2735_v49 = vadd.f32 %v2664_v11, %v5899_v59 }
 0x1ef   : > { %vm3079_vm3 = vcmp.gt.f32.partialorder %v3071_v61, 0.0  ;;  %v3087_v54 = vmul.f32 0.01, %v3071_v61  ;;  %v3070_v39 = vadd.f32 %v5727_v25, %v3055_v27  ;;  %v3058_v15 = vmax.f32 %v3042_v23, %v3050_v63  ;;  %v4373_v62 = vpop.f32.mrf.mxu0 }
 0x1f0   : > { %v3049_v2 = vmax.f32 %v3025_v16, %v3033_v33  ;;  %v3036_v30 = vadd.f32 %v4370_v48, %v2742_v19  ;;  %v2741_v31 = vadd.f32 %v2694_v38, %v2447_v28  ;;  %v4323_v8 = vpop.f32.mrf.mxu1  ;;  %v3029_v16 = vadd.f32 %v5703_v42, %v2735_v49 }
 0x1f1   : > { %v3095_v57 = vsel %vm3079_vm3, %v3071_v61, %v3087_v54  ;;  %vm3078_vm4 = vcmp.gt.f32.partialorder %v3070_v39, 0.0  ;;  %v3086_v17 = vmul.f32 0.01, %v3070_v39  ;;  %v3073_v52 = vadd.f32 %v5727_v25, %v3058_v15  ;;  %v2998_v0 = vpop.f32.mrf.mxu0 }
 0x1f2   : > { %v3110_v3 = vmul.f32 %v5742_v4, %v3095_v57  ;;  %v3057_v23 = vmax.f32 %v5900_v32, %v3049_v2  ;;  %v3052_v11 = vmax.f32 %v3028_v10, %v3036_v30  ;;  %v3035_v37 = vadd.f32 %v2988_v46, %v2741_v31  ;;  %v2704_v60 = vpop.f32.mrf.mxu1 }
 0x1f3   : > { %v3094_v1 = vsel %vm3078_vm4, %v3070_v39, %v3086_v17  ;;  %vm3081_vm5 = vcmp.gt.f32.partialorder %v3073_v52, 0.0  ;;  %v3089_v36 = vmul.f32 0.01, %v3073_v52  ;;  %v2744_v34 = vadd.f32 %v4323_v8, %v2450_v35 }
 0x1f4   : > { %v3125_v9 = vadd.f32 %v5753_v40, %v3110_v3  ;;  %v3109_v58 = vmul.f32 %v5742_v4, %v3094_v1  ;;  %v3072_v29 = vadd.f32 %v5727_v25, %v3057_v23  ;;  %v3060_v50 = vmax.f32 %v5901_v56, %v3052_v11 }
 0x1f5   : > { %v3097_v14 = vsel %vm3081_vm5, %v3073_v52, %v3089_v36  ;;  %v3051_v44 = vmax.f32 %v3027_v22, %v3035_v37  ;;  %v3038_v55 = vadd.f32 %v4373_v62, %v2744_v34  ;;  %v2743_v53 = vadd.f32 %v2704_v60, %v5902_v21 }
 0x1f6   : > { %3134 = vst.msk [vmem:[%s5763_s27 + $0x8] sm:$0xff] %vm3132_vm2, %v3125_v9  ;;  %v3124_v20 = vadd.f32 %v5753_v40, %v3109_v58  ;;  %v3112_v24 = vmul.f32 %v5742_v4, %v3097_v14  ;;  %vm3080_vm6 = vcmp.gt.f32.partialorder %v3072_v29, 0.0  ;;  %v3088_v41 = vmul.f32 0.01, %v3072_v29 }
 0x1f7   : > { %v3075_v28 = vadd.f32 %v5727_v25, %v3060_v50  ;;  %v3059_v51 = vmax.f32 %v5903_v43, %v3051_v44  ;;  %v3054_v6 = vmax.f32 %v3030_v18, %v3038_v55  ;;  %v3037_v35 = vadd.f32 %v2998_v0, %v2743_v53 }
 0x1f8   : > { %3133 = vst.msk [vmem:[%s5763_s27] sm:$0xff] %vm3132_vm2, %v3124_v20  ;;  %v3127_v13 = vadd.f32 %v5753_v40, %v3112_v24  ;;  %v3096_v48 = vsel %vm3080_vm6, %v3072_v29, %v3088_v41  ;;  %v5905_v38 = vmax.f32 %v5689_v47, %v5693_v45 }
 0x1f9   : > { %v3111_v61 = vmul.f32 %v5742_v4, %v3096_v48  ;;  %vm3083_vm7 = vcmp.gt.f32.partialorder %v3075_v28, 0.0  ;;  %v3091_v27 = vmul.f32 0.01, %v3075_v28  ;;  %v3074_v63 = vadd.f32 %v5727_v25, %v3059_v51 }
 0x1fa   : > { %3136 = vst.msk [vmem:[%s5763_s27 + $0x18] sm:$0xff] %vm3132_vm2, %v3127_v13  ;;  %v3062_v5 = vmax.f32 %v5904_v12, %v3054_v6  ;;  %v3053_v42 = vmax.f32 %v3029_v16, %v3037_v35 }
 0x1fb   : > { %v3126_v33 = vadd.f32 %v5753_v40, %v3111_v61  ;;  %v3099_v10 = vsel %vm3083_vm7, %v3075_v28, %v3091_v27  ;;  %vm3082_vm8 = vcmp.gt.f32.partialorder %v3074_v63, 0.0  ;;  %v3090_v22 = vmul.f32 0.01, %v3074_v63 }
 0x1fc   : > { %v3114_v18 = vmul.f32 %v5742_v4, %v3099_v10  ;;  %v3077_v19 = vadd.f32 %v5727_v25, %v3062_v5  ;;  %v3061_v46 = vmax.f32 %v5905_v38, %v3053_v42 }
 0x1fd   : > { %3135 = vst.msk [vmem:[%s5763_s27 + $0x10] sm:$0xff] %vm3132_vm2, %v3126_v33  ;;  %v3098_v7 = vsel %vm3082_vm8, %v3074_v63, %v3090_v22 }
 0x1fe   : > { %v3129_v26 = vadd.f32 %v5753_v40, %v3114_v18  ;;  %v3113_v54 = vmul.f32 %v5742_v4, %v3098_v7  ;;  %vm3085_vm9 = vcmp.gt.f32.partialorder %v3077_v19, 0.0  ;;  %v3093_v39 = vmul.f32 0.01, %v3077_v19 }
 0x1ff   : > { %v3076_v15 = vadd.f32 %v5727_v25, %v3061_v46 }
 0x200   : > { %3138 = vst.msk [vmem:[%s5763_s27 + $0x28] sm:$0xff] %vm3132_vm2, %v3129_v26  ;;  %v3128_v59 = vadd.f32 %v5753_v40, %v3113_v54  ;;  %v3101_v49 = vsel %vm3085_vm9, %v3077_v19, %v3093_v39 }
 0x201   : > { %v3116_v47 = vmul.f32 %v5742_v4, %v3101_v49  ;;  %vm3084_vm10 = vcmp.gt.f32.partialorder %v3076_v15, 0.0  ;;  %v3092_v45 = vmul.f32 0.01, %v3076_v15 }
 0x202   : > { %3137 = vst.msk [vmem:[%s5763_s27 + $0x20] sm:$0xff] %vm3132_vm2, %v3128_v59 }
 0x203   : > { %v3131_v2 = vadd.f32 %v5753_v40, %v3116_v47  ;;  %v3100_v30 = vsel %vm3084_vm10, %v3076_v15, %v3092_v45 }
 0x204   : > { %v3115_v31 = vmul.f32 %v5742_v4, %v3100_v30 }
 0x205   : > { %3140 = vst.msk [vmem:[%s5763_s27 + $0x38] sm:$0xff] %vm3132_vm2, %v3131_v2 }
 0x206   : > { %v3130_v25 = vadd.f32 %v5753_v40, %v3115_v31 }
 0x208   : > { %3139 = vst.msk [vmem:[%s5763_s27 + $0x30] sm:$0xff] %vm3132_vm2, %v3130_v25 }
 0x209 PF: > { %s15_s18 = sadd.s32 1, %s4391_s18  }
 0x20a   : > { %p12_p4 = scmp.ge.s32.totalorder %s15_s18, 4  }
 0x20c   :  { %14 = sbr.rel (!%p12_p4) target bundleno = 1 (0x1), region = 85 }

</bundles_post_ra>
